<compile_context>
chip_gen: v6e
topology: v6e:2x2x1
jax: 0.10.0
libtpu: 0.0.40
codegen_flags: <defaults>
</compile_context>

<pallas_src>
import functools

import jax
import jax.numpy as jnp
from jax.experimental import pallas as pl
from jax.experimental.pallas import tpu as pltpu

_INV_SQRT2 = 0.7071067811865476          # hoisted 1/sqrt(2)
_VMEM_LIMIT = 32 * 1024 * 1024           # explicit scoped-VMEM cap (v5e/v6e/v7x safe)
_TILE = 256                              # node tile (multiple of 8 sublanes / 128 lanes)


def _gelu(v):
    # exact (erf-based) GELU, matching torch.nn.GELU() default
    return 0.5 * v * (1.0 + jax.lax.erf(v * _INV_SQRT2))


def _round_up(v, m):
    return ((v + m - 1) // m) * m


def _choose_tiles(n, tile=_TILE):
    npd = _round_up(n, 8)
    if npd >= tile:
        npd = _round_up(n, tile)
        return npd, tile, tile
    # tiny graphs: single full-extent block (block_shape == full padded dims)
    return npd, npd, npd


# --------------------------- tiled GCN propagation ---------------------------
# One GCNConv layer:  out = act( A_hat @ (src @ W) + b )
# grid = (row blocks i [parallel], A-column blocks k [arbitrary reduction]).
# The per-(i,k) src @ W transform is redundant across i but fully hidden under
# the HBM-bound streaming of the (tm, tk) A tile.

def _gcn_prop_kernel(a_ref, src_ref, w_ref, b_ref, out_ref, acc_ref, *, act):
    k = pl.program_id(1)

    @pl.when(k == 0)
    def _():
        acc_ref[...] = jnp.zeros_like(acc_ref)

    t = jnp.dot(src_ref[...], w_ref[...], preferred_element_type=jnp.float32)
    acc_ref[...] += jnp.dot(a_ref[...], t, preferred_element_type=jnp.float32)

    @pl.when(k == pl.num_programs(1) - 1)
    def _():
        r = acc_ref[...] + b_ref[...]            # bias only on the final k block
        if act:
            r = _gelu(r)
        out_ref[...] = r


def _gcn_prop(a, src, w, b, *, act, tm, tk):
    npd = a.shape[0]
    f_in = src.shape[1]
    f_out = w.shape[1]
    kernel = functools.partial(_gcn_prop_kernel, act=act)
    return pl.pallas_call(
        kernel,
        out_shape=jax.ShapeDtypeStruct((npd, f_out), jnp.float32),
        grid_spec=pltpu.PrefetchScalarGridSpec(
            num_scalar_prefetch=0,
            grid=(npd // tm, npd // tk),
            in_specs=[
                pl.BlockSpec((tm, tk), lambda i, k: (i, k)),       # A tile
                pl.BlockSpec((tk, f_in), lambda i, k: (k, 0)),     # src row band (k)
                pl.BlockSpec((f_in, f_out), lambda i, k: (0, 0)),  # resident weight
                pl.BlockSpec((1, f_out), lambda i, k: (0, 0)),     # resident bias
            ],
            out_specs=pl.BlockSpec((tm, f_out), lambda i, k: (i, 0)),
            scratch_shapes=[pltpu.VMEM((tm, f_out), jnp.float32)],
        ),
        compiler_params=pltpu.CompilerParams(
            dimension_semantics=("parallel", "arbitrary"),
            vmem_limit_bytes=_VMEM_LIMIT,
        ),
    )(a, src, w, b)


# ------------- row-parallel merged MLPs + reparameterization kernel -----------

def _row_mlp_kernel(h_ref, noise_ref, wslab_ref, bslab_ref, out_ref, *,
                    meta_enc, meta_dec, latent):
    def run_mlp(v, meta):
        for (r0, cin, cout, brow, act) in meta:          # static slab offsets
            w = wslab_ref[r0:r0 + cin, 0:cout]
            b = bslab_ref[brow:brow + 1, 0:cout]
            v = jnp.dot(v, w, preferred_element_type=jnp.float32) + b
            if act:
                v = _gelu(v)
        return v

    e = run_mlp(h_ref[...], meta_enc)                    # [mu | logstd]
    mu = e[:, :latent]
    logstd = jnp.minimum(e[:, latent:2 * latent], 10.0)  # .clamp(max=10)
    z = mu + noise_ref[...] * jnp.exp(logstd)
    out_ref[...] = run_mlp(z, meta_dec)                  # [z1 | z2]


def _row_mlp(h, noise, wslab, bslab, *, meta_enc, meta_dec, latent, f_out, tm):
    npd, f_h = h.shape
    kernel = functools.partial(_row_mlp_kernel, meta_enc=meta_enc,
                               meta_dec=meta_dec, latent=latent)
    return pl.pallas_call(
        kernel,
        out_shape=jax.ShapeDtypeStruct((npd, f_out), jnp.float32),
        grid_spec=pltpu.PrefetchScalarGridSpec(
            num_scalar_prefetch=0,
            grid=(npd // tm,),
            in_specs=[
                pl.BlockSpec((tm, f_h), lambda i: (i, 0)),
                pl.BlockSpec((tm, noise.shape[1]), lambda i: (i, 0)),
                pl.BlockSpec(wslab.shape, lambda i: (0, 0)),   # resident weight slab
                pl.BlockSpec(bslab.shape, lambda i: (0, 0)),   # resident bias slab
            ],
            out_specs=pl.BlockSpec((tm, f_out), lambda i: (i, 0)),
        ),
        compiler_params=pltpu.CompilerParams(
            dimension_semantics=("parallel",),
            vmem_limit_bytes=_VMEM_LIMIT,
        ),
    )(h, noise, wslab, bslab)


# -------------------------- host-side weight plumbing --------------------------

def _block_diag(w1, w2):
    z12 = jnp.zeros((w1.shape[0], w2.shape[1]), jnp.float32)
    z21 = jnp.zeros((w2.shape[0], w1.shape[1]), jnp.float32)
    top = jnp.concatenate([w1, z12], axis=1)
    bot = jnp.concatenate([z21, w2], axis=1)
    return jnp.concatenate([top, bot], axis=0)


def _merge_mlps(p1, p2):
    """Merge two same-shape MLP branches that consume the same input.

    Layer 0: concat outputs (shared input).  Layers 1+: block-diagonal (exact;
    zero blocks contribute exactly 0 in f32).  Kept because 2*hid = 64 <= 128
    MXU lanes (review: gate block-diag by width)."""
    merged = []
    for i, ((w1, b1), (w2, b2)) in enumerate(zip(p1, p2)):
        w = jnp.concatenate([w1, w2], axis=1) if i == 0 else _block_diag(w1, w2)
        merged.append((w, jnp.concatenate([b1, b2], axis=0)))
    return merged


def _pack_mlp_slab(enc_layers, dec_layers):
    """Pack all merged-MLP weights/biases into one weight slab + one bias slab."""
    width = max(w.shape[1] for (w, _) in list(enc_layers) + list(dec_layers))
    w_rows, b_rows = [], []

    def add(layers):
        meta = []
        off = sum(m.shape[0] for m in w_rows)
        n = len(layers)
        for i, (w, b) in enumerate(layers):
            cin, cout = w.shape
            w_rows.append(jnp.pad(w, ((0, 0), (0, width - cout))))
            b_rows.append(jnp.pad(b, (0, width - cout)))
            meta.append((off, cin, cout, len(b_rows) - 1, i < n - 1))
            off += cin
        return tuple(meta)

    meta_e = add(enc_layers)
    meta_d = add(dec_layers)
    wslab = jnp.concatenate(w_rows, axis=0).astype(jnp.float32)
    bslab = jnp.stack(b_rows, axis=0).astype(jnp.float32)
    return wslab, bslab, meta_e, meta_d


# ------------------------------ full forward pass ------------------------------

def gram_base_forward(params, x, a_hat, noise):
    n, in_dim = x.shape
    enc = params["shared_encoder"]
    attr = params["attr_decoder"]
    struct = params["struct_decoder"]
    hid = enc[-1][0].shape[1]
    latent = params["encode_liner1"][-1][0].shape[1]
    assert len(attr) == len(struct) + 1

    npd, tm, tk = _choose_tiles(n)
    pad = npd - n
    a = jnp.pad(a_hat, ((0, pad), (0, pad)))      # zero-padded rows/cols are inert
    h = jnp.pad(x, ((0, pad), (0, 0)))
    nz = jnp.pad(noise, ((0, pad), (0, 0)))

    emlp = _merge_mlps(params["encode_liner1"], params["encode_liner2"])
    dmlp = _merge_mlps(params["decode_liner1"], params["decode_liner2"])
    wslab, bslab, meta_e, meta_d = _pack_mlp_slab(emlp, dmlp)

    # ---- shared encoder GCN: one tiled propagation kernel per layer ----
    nl = len(enc)
    for li, (w, b) in enumerate(enc):
        h = _gcn_prop(a, h, w, b.reshape(1, -1), act=(li < nl - 1), tm=tm, tk=tk)

    # ---- merged encoder MLPs + reparam + merged decoder MLPs (row-parallel) ----
    z12 = _row_mlp(h, nz, wslab, bslab, meta_enc=meta_e, meta_dec=meta_d,
                   latent=latent, f_out=2 * hid, tm=tm)

    # ---- attr_decoder layer 0 (consumes z1); zero-pad weight so the merged
    #      [z1|z2] slab feeds it directly (zero rows contribute exactly 0) ----
    wa0, ba0 = attr[0]
    wa0p = jnp.concatenate([wa0, jnp.zeros((hid, wa0.shape[1]), jnp.float32)], axis=0)
    u = _gcn_prop(a, z12, wa0p, ba0.reshape(1, -1), act=(len(attr) > 1), tm=tm, tk=tk)

    # ---- remaining attr layers pair 1:1 with struct layers; fuse the A
    #      propagation: A @ [Ha|Hs] == [A@Ha | A@Hs] (exact) ----
    cur = jnp.concatenate([u, z12[:, hid:]], axis=1)
    n_rest = len(struct)
    for j in range(n_rest):
        wa, ba = attr[j + 1]
        ws, bs = struct[j]
        wf = _block_diag(wa, ws)
        bf = jnp.concatenate([ba, bs], axis=0).reshape(1, -1)
        cur = _gcn_prop(a, cur, wf, bf, act=(j < n_rest - 1), tm=tm, tk=tk)

    # final fused output is lane-combined [x_ | z_e]; split and drop padding
    return cur[:n, :in_dim], cur[:n, in_dim:]


# ------------------------------ parameter setup ------------------------------

def _init_linear(key, cin, cout, scale=0.1):
    kw, kb = jax.random.split(key)
    w = scale * jax.random.normal(kw, (cin, cout), jnp.float32)
    b = scale * jax.random.normal(kb, (cout,), jnp.float32)
    return w, b


def init_gcn_params(key, in_ch, hid_ch, out_ch, num_layers):
    dims = [in_ch] + [hid_ch] * (num_layers - 1) + [out_ch]
    keys = jax.random.split(key, num_layers)
    return [_init_linear(keys[i], dims[i], dims[i + 1]) for i in range(num_layers)]


def init_mlp_params(key, dims):
    keys = jax.random.split(key, len(dims) - 1)
    return [_init_linear(keys[i], dims[i], dims[i + 1]) for i in range(len(dims) - 1)]


def build_normalized_adjacency(edge_index, num_nodes):
    """Dense A_hat = D^{-1/2}(A + I)D^{-1/2} (GCNConv default norm, symmetric)."""
    src, dst = edge_index[0], edge_index[1]
    a = jnp.zeros((num_nodes, num_nodes), jnp.float32)
    a = a.at[dst, src].set(1.0)
    a = a.at[src, dst].set(1.0)
    a = a + jnp.eye(num_nodes, dtype=jnp.float32)
    deg = a.sum(axis=1)
    dinv = jax.lax.rsqrt(deg)
    return dinv[:, None] * a * dinv[None, :]


# ------------------------------ pure-JAX reference ------------------------------

def _reference_forward(params, x, a_hat, noise):
    def mlp(h, layers):
        for i, (w, b) in enumerate(layers):
            h = h @ w + b
            if i < len(layers) - 1:
                h = _gelu(h)
        return h

    def gcn(h, layers):
        for i, (w, b) in enumerate(layers):
            h = a_hat @ (h @ w) + b
            if i < len(layers) - 1:
                h = _gelu(h)
        return h

    h = gcn(x, params["shared_encoder"])
    mu = mlp(h, params["encode_liner1"])
    ls = jnp.minimum(mlp(h, params["encode_liner2"]), 10.0)
    z = mu + noise * jnp.exp(ls)
    x_ = gcn(mlp(z, params["decode_liner1"]), params["attr_decoder"])
    z_e = gcn(mlp(z, params["decode_liner2"]), params["struct_decoder"])
    return x_, z_e


# ----------------------------------- main -----------------------------------

if __name__ == "__main__":
    N, IN_DIM, HID_DIM, LATENT = 512, 16, 32, 8       # 512 nodes -> 2x2 tile grid
    NUM_LAYERS = 6                                    # encoder 3 / decoder 3 layers
    enc_layers = NUM_LAYERS // 2
    dec_layers = NUM_LAYERS - enc_layers

    key = jax.random.PRNGKey(0)
    kx, knoise, k1, k2, k3, k4, k5, k6, k7 = jax.random.split(key, 9)

    # deterministic inputs: ring graph
    x = jax.random.normal(kx, (N, IN_DIM), jnp.float32)
    ring = jnp.arange(N, dtype=jnp.int32)
    edge_index = jnp.stack([ring, (ring + 1) % N])
    edge_index = jnp.concatenate([edge_index, edge_index[::-1]], axis=1)
    a_hat = build_normalized_adjacency(edge_index, N)

    params = {
        "shared_encoder": init_gcn_params(k1, IN_DIM, HID_DIM, HID_DIM, enc_layers),
        "encode_liner1": init_mlp_params(k2, [HID_DIM, HID_DIM, HID_DIM, LATENT]),
        "encode_liner2": init_mlp_params(k3, [HID_DIM, HID_DIM, HID_DIM, LATENT]),
        "decode_liner1": init_mlp_params(k4, [LATENT, HID_DIM, HID_DIM, HID_DIM]),
        "decode_liner2": init_mlp_params(k5, [LATENT, HID_DIM, HID_DIM, HID_DIM]),
        "attr_decoder": init_gcn_params(k6, HID_DIM, HID_DIM, IN_DIM, dec_layers),
        "struct_decoder": init_gcn_params(k7, HID_DIM, HID_DIM, IN_DIM, dec_layers - 1),
    }

    # reparameterization noise (torch.randn_like equivalent, deterministic key)
    noise = jax.random.normal(knoise, (N, LATENT), jnp.float32)

    x_, z_e = gram_base_forward(params, x, a_hat, noise)
    jax.block_until_ready((x_, z_e))

    assert x_.shape == (N, IN_DIM) and z_e.shape == (N, IN_DIM)
    assert bool(jnp.all(jnp.isfinite(x_))) and bool(jnp.all(jnp.isfinite(z_e)))

    # correctness vs. pure-JAX reference of the torch forward
    xr, zr = _reference_forward(params, x, a_hat, noise)
    assert bool(jnp.allclose(x_, xr, atol=1e-3, rtol=1e-3))
    assert bool(jnp.allclose(z_e, zr, atol=1e-3, rtol=1e-3))

    print("KERNEL_OK")
</pallas_src>

<mosaic_0001>
module attributes {stable_mosaic.version = 11 : i64} {
  func.func @_gcn_prop_kernel(%arg0: i32, %arg1: i32, %arg2: memref<256x256xf32, #tpu.memory_space<vmem>>, %arg3: memref<256x16xf32, #tpu.memory_space<vmem>>, %arg4: memref<16x32xf32, #tpu.memory_space<vmem>>, %arg5: memref<1x32xf32, #tpu.memory_space<vmem>>, %arg6: memref<256x32xf32, #tpu.memory_space<vmem>>, %arg7: memref<256x32xf32, #tpu.memory_space<vmem>>) attributes {dimension_semantics = [#tpu.dimension_semantics<parallel>, #tpu.dimension_semantics<arbitrary>], iteration_bounds = array<i64: 2, 2>, scalar_prefetch = 0 : i64, scratch_operands = 1 : i64, tpu.core_type = #tpu.core_type<tc>, window_params = [{transform_indices = @transform_0, window_bounds = array<i64: 256, 256>}, {transform_indices = @transform_1, window_bounds = array<i64: 256, 16>}, {pipeline_mode = #tpu.pipeline_mode<synchronous>, transform_indices = @transform_2, window_bounds = array<i64: 16, 32>}, {pipeline_mode = #tpu.pipeline_mode<synchronous>, transform_indices = @transform_3, window_bounds = array<i64: 1, 32>}, {transform_indices = @transform_4, window_bounds = array<i64: 256, 32>}]} {
    %c0_i32 = arith.constant 0 : i32
    %0 = arith.cmpi eq, %arg1, %c0_i32 : i32
    %1 = arith.extui %0 : i1 to i32
    %c0_i32_0 = arith.constant 0 : i32
    %2 = arith.cmpi ne, %1, %c0_i32_0 : i32
    scf.if %2 {
      %cst_12 = arith.constant 0.000000e+00 : f32
      %14 = vector.broadcast %cst_12 : f32 to vector<256x32xf32>
      %c0_13 = arith.constant 0 : index
      %c0_14 = arith.constant 0 : index
      %15 = vector.load %arg7[%c0_13, %c0_14] : memref<256x32xf32, #tpu.memory_space<vmem>>, vector<256x32xf32>
      tpu.vector_store %arg7[%c0_13, %c0_14], %14 {strides = array<i32>} : memref<256x32xf32, #tpu.memory_space<vmem>>, vector<256x32xf32>,
    } else {
    }
    %c0 = arith.constant 0 : index
    %c0_1 = arith.constant 0 : index
    %3 = vector.load %arg3[%c0, %c0_1] : memref<256x16xf32, #tpu.memory_space<vmem>>, vector<256x16xf32>
    %c0_2 = arith.constant 0 : index
    %c0_3 = arith.constant 0 : index
    %4 = vector.load %arg4[%c0_2, %c0_3] : memref<16x32xf32, #tpu.memory_space<vmem>>, vector<16x32xf32>
    %cst = arith.constant dense<0.000000e+00> : vector<256x32xf32>
    %5 = tpu.matmul %3, %4, %cst {dimension_numbers = #tpu.dot_dimension_numbers<[1], [0], [0], [1], [0, 0, 1, 1], [], []>} : vector<256x16xf32>, vector<16x32xf32>, vector<256x32xf32> -> vector<256x32xf32>
    %c0_4 = arith.constant 0 : index
    %c0_5 = arith.constant 0 : index
    %6 = vector.load %arg7[%c0_4, %c0_5] : memref<256x32xf32, #tpu.memory_space<vmem>>, vector<256x32xf32>
    %c0_6 = arith.constant 0 : index
    %c0_7 = arith.constant 0 : index
    %7 = vector.load %arg2[%c0_6, %c0_7] : memref<256x256xf32, #tpu.memory_space<vmem>>, vector<256x256xf32>
    %cst_8 = arith.constant dense<0.000000e+00> : vector<256x32xf32>
    %8 = tpu.matmul %7, %5, %cst_8 {dimension_numbers = #tpu.dot_dimension_numbers<[1], [0], [0], [1], [0, 0, 1, 1], [], []>} : vector<256x256xf32>, vector<256x32xf32>, vector<256x32xf32> -> vector<256x32xf32>
    %9 = arith.addf %6, %8 : vector<256x32xf32>
    %c0_9 = arith.constant 0 : index
    %c0_10 = arith.constant 0 : index
    %10 = vector.load %arg7[%c0_9, %c0_10] : memref<256x32xf32, #tpu.memory_space<vmem>>, vector<256x32xf32>
    tpu.vector_store %arg7[%c0_9, %c0_10], %9 {strides = array<i32>} : memref<256x32xf32, #tpu.memory_space<vmem>>, vector<256x32xf32>,
    %c1_i32 = arith.constant 1 : i32
    %11 = arith.cmpi eq, %arg1, %c1_i32 : i32
    %12 = arith.extui %11 : i1 to i32
    %c0_i32_11 = arith.constant 0 : i32
    %13 = arith.cmpi ne, %12, %c0_i32_11 : i32
    scf.if %13 {
      %c0_12 = arith.constant 0 : index
      %c0_13 = arith.constant 0 : index
      %14 = vector.load %arg7[%c0_12, %c0_13] : memref<256x32xf32, #tpu.memory_space<vmem>>, vector<256x32xf32>
      %c0_14 = arith.constant 0 : index
      %c0_15 = arith.constant 0 : index
      %15 = vector.load %arg5[%c0_14, %c0_15] : memref<1x32xf32, #tpu.memory_space<vmem>>, vector<1x32xf32>
      %16 = vector.broadcast %15 : vector<1x32xf32> to vector<256x32xf32>
      %17 = arith.addf %14, %16 : vector<256x32xf32>
      %cst_16 = arith.constant 5.000000e-01 : f32
      %18 = vector.broadcast %cst_16 : f32 to vector<256x32xf32>
      %19 = arith.mulf %18, %17 : vector<256x32xf32>
      %cst_17 = arith.constant 0.707106769 : f32
      %20 = vector.broadcast %cst_17 : f32 to vector<256x32xf32>
      %21 = arith.mulf %17, %20 : vector<256x32xf32>
      %22 = math.erf %21 : vector<256x32xf32>
      %cst_18 = arith.constant 1.000000e+00 : f32
      %23 = vector.broadcast %cst_18 : f32 to vector<256x32xf32>
      %24 = arith.addf %23, %22 : vector<256x32xf32>
      %25 = arith.mulf %19, %24 : vector<256x32xf32>
      %c0_19 = arith.constant 0 : index
      %c0_20 = arith.constant 0 : index
      %26 = vector.load %arg6[%c0_19, %c0_20] : memref<256x32xf32, #tpu.memory_space<vmem>>, vector<256x32xf32>
      tpu.vector_store %arg6[%c0_19, %c0_20], %25 {strides = array<i32>} : memref<256x32xf32, #tpu.memory_space<vmem>>, vector<256x32xf32>,
    } else {
    }
    return
  }
  func.func @transform_0(%arg0: i32, %arg1: i32) -> (i32, i32) {
    %c0_i32 = arith.constant 0 : i32
    return %arg0, %arg1 : i32, i32
  }
  func.func @transform_1(%arg0: i32, %arg1: i32) -> (i32, i32) {
    %c0_i32 = arith.constant 0 : i32
    %c0_i32_0 = arith.constant 0 : i32
    return %arg1, %c0_i32 : i32, i32
  }
  func.func @transform_2(%arg0: i32, %arg1: i32) -> (i32, i32) {
    %c0_i32 = arith.constant 0 : i32
    %c0_i32_0 = arith.constant 0 : i32
    %c0_i32_1 = arith.constant 0 : i32
    return %c0_i32, %c0_i32_0 : i32, i32
  }
  func.func @transform_3(%arg0: i32, %arg1: i32) -> (i32, i32) {
    %c0_i32 = arith.constant 0 : i32
    %c0_i32_0 = arith.constant 0 : i32
    %c0_i32_1 = arith.constant 0 : i32
    return %c0_i32, %c0_i32_0 : i32, i32
  }
  func.func @transform_4(%arg0: i32, %arg1: i32) -> (i32, i32) {
    %c0_i32 = arith.constant 0 : i32
    %c0_i32_0 = arith.constant 0 : i32
    return %arg0, %c0_i32 : i32, i32
  }
}

</mosaic_0001>

<bundles_post_ra>
// kernel: tpu_custom_call.1
= control target key start
LH: loop header
LB: loop body
LE: loop exit
PB: predicated region body
PF: predicated region fallthrough
CT: control target
= control target key end

     0   :  { %9 = vsyncpa [#allocation4], 0  ;;  %s2519_s0 = inlined_call_operand.hbm [shape: f32[512,512], index: 0, kind: input, shape index: {}]   ;;  %s2520_s1 = inlined_call_operand.vmem [shape: f32[512,16], index: 1, kind: input, shape index: {}]   ;;  %s2521_s2 = inlined_call_operand.vmem [shape: f32[16,32], index: 2, kind: input, shape index: {}]   ;;  %s2522_s3 = inlined_call_operand.vmem [shape: f32[1,32], index: 3, kind: input, shape index: {}]   ;;  %s2523_s4 = inlined_call_operand.vmem [shape: f32[512,32], index: 4, kind: output, shape index: {}]  }
   0x1   :  { %11 = vsyncpa [#allocation4 + $0x1], 0  ;;  %s1870_s15 = smov 0   ;;  %s1872_s16 = smov 0  }
   0x2   :  { %s1874_s17 = smov 0   ;;  %s1876_s18 = smov 0  }
   0x3   :  { %s1878_s19 = smov 0   ;;  %s1880_s20 = smov 0  }
   0x4   :  { %s1882_s21 = smov 0   ;;  %s1884_s22 = smov 0  }
   0x5 LB: > { %s1400_s23 = sadd.s32 4294967295, %s1837_s22   ;;  %s26_s24 = sadd.s32 1, %s1829_s20  ;;  %s1837_s22 = sphi %s1884_s22, %s17_s22   ;;  %s1833_s21 = sphi %s1882_s21, %s2536_s21   ;;  %s1829_s20 = sphi %s1880_s20, %s2535_s20   ;;  %s1825_s19 = sphi %s1878_s19, %s2534_s19   ;;  %s1821_s18 = sphi %s1876_s18, %s2533_s18   ;;  %s1817_s17 = sphi %s1874_s17, %s2532_s17   ;;  %s1813_s16 = sphi %s1872_s16, %s2531_s16   ;;  %s1809_s15 = sphi %s1870_s15, %s2530_s15  }
   0x6   : > { %p27_p0 = scmp.ge.s32.totalorder %s26_s24, 2  ;;  %s29_s25 = sadd.s32 1, %s1833_s21 }
   0x7   : > { %s38_s26 = sadd.s32 1, %s1817_s17  ;;  %p45_p1 = scmp.ne.s32.totalorder %s1817_s17, %s1813_s16 }
   0x8   : > { %s2538_s24 = smov (%p27_p0, %s26_s24), 0  ;;  %s2540_s25 = smov (!%p27_p0, %s29_s25), %s1833_s21 }
   0x9   : > { %2525 = sst [smem:[#allocation6_spill]] %s2538_s24  ;;  %s34_s27 = ssub.s32 %s1829_s20, %s2538_s24 }
   0xa   : > { %p46_p2 = scmp.eq.s32.totalorder %s1837_s22, 0  ;;  %p31_p3 = scmp.ge.s32.totalorder %s2540_s25, 2 }
   0xb   : > { %p51_p4 = scmp.ne.s32.totalorder %s1813_s16, %s1809_s15  ;;  %p52_p6 = scmp.eq.s32.totalorder %s1400_s23, 0 }
   0xc   : > { %p1921_p5 = por %p46_p2, %p45_p1  ;;  %s2542_s25 = smov (%p31_p3, %s2540_s25), 0 }
   0xd   : > { %p1927_p7 = por %p52_p6, %p51_p4  ;;  %s33_s30 = ssub.s32 %s1833_s21, %s2542_s25 }
   0xe   : > { %p1609_p8 = scmp.lt.s32.totalorder %s1837_s22, 4  ;;  %s35_s5 = sor.u32 %s34_s27, %s33_s30 }
   0xf   : > { %s175_s6 = sand.u32 1, %s1817_s17   ;;  %p36_p9 = scmp.eq.s32.totalorder %s35_s5, 0 }
  0x10   : > { %s1404_s7 = sshll.u32 %s175_s6, 9  ;;  %s1406_s8 = sshll.u32 %s1829_s20, 1 }
  0x11   : > { %s1937_s9 = scalar_select %p36_p9, %s1817_s17, %s38_s26  }
  0x12   : > { %s1452_s10 = sshll.u32 %s1833_s21, 7  ;;  %s179_s12 = scalar_lea.vmem [#allocation3], %s1404_s7 }
  0x13   : > { %s186_s11 = sadd.s32 %s1452_s10, %s1406_s8  ;;  %s189_s13 = sshll.u32 %s179_s12, 4  ;;  %s190_s13 = int_to_ptr.vmem [resolvable:$true] %s189_s13 }
  0x14   : > { %s1408_s14 = sshll.u32 %s186_s11, 7  ;;  %p1947_p10 = pnand %p1609_p8, %p1921_p5 }
  0x15   : > { %s188_s24 = scalar_lea.hbm %s2519_s0, %s1408_s14  ;;  %s176_s30 = scalar_lea.sflag [#allocation4], %s175_s6 }
  0x16   : > { %p1745_p11 = pneg %p1947_p10  ;;  %s1756_s26 = scalar_lea.vmem %s190_s13, 8192 }
  0x17   : > { %p1757_p12 = scmp.ne.s32.totalorder %s190_s13, %s1756_s26  ;;  %s1839_s5 = smov [#allocation3]  }
  0x18   : > { %s1761_s7 = sshll.u32 %s1839_s5, 4  ;;  %s1762_s7 = int_to_ptr.vmem [resolvable:$false] %s1761_s7 }
  0x19   : > { %p1759_p13 = pnand %p1757_p12, %p1745_p11  ;;  %s1763_s8 = scalar_lea.vmem %s1762_s7, 16384 }
  0x1a   : > { %p1764_p1 = scmp.lt.s32.totalorder %s190_s13, %s1762_s7  ;;  %p1765_p2 = scmp.lt.s32.totalorder %s1763_s8, %s1756_s26 }
  0x1b   : > { %p1760_p0 = pneg %p1759_p13 }
  0x1c   : > { %p1766_p3 = por %p1765_p2, %p1764_p1 }
  0x1e   : > { %p1767_p4 = pnand %p1766_p3, %p1760_p0 }
  0x20   : > { %1770 = shalt.err (!%p1767_p4)
}
  0x21   : > { %s1840_s28 = smov 512   ;;  %s1841_s6 = smov 256  }
  0x22   : > { %s1842_s10 = smov 16   ;;  %p1409_p5 = scmp.ge.s32.totalorder %s1837_s22, 1 }
  0x23   : > { %1608 = dma.hbm_to_vmem [thread:$0]  (!%p1947_p10), %s188_s24, 8192, %s190_s13, %s176_s30, %s1840_s28, %s1841_s6, %s1842_s10  }
  0x24   : > { %p206_p6 = scmp.lt.s32.totalorder %s1837_s22, 5 }
  0x26   : > { %p207_p8 = pnand %p1409_p5, %p206_p6 }
  0x27   : > { %s212_s11 = sand.u32 (!%p207_p8), 1, %s1813_s16  }
  0x28   : > { %210 = sbr.rel (%p207_p8) target bundleno = 686 (0x2ae), region = 36  ;;  %s1410_s12 = sshll.u32 (!%p207_p8), %s212_s11, 9 }
  0x29   : > { %s213_s14 = scalar_lea.sflag (!%p207_p8), [#allocation4], %s212_s11  ;;  %s1958_s15 = scalar_lea.vmem (!%p207_p8), [#allocation3], %s1410_s12 }
  0x2d   : > { %1804 = dma.done.wait (%p1927_p7), %s213_s14, 8192  }
  0x2e   : > { %1806 = vsyncadd (%p1927_p7), %s213_s14, 4294959104  ;;  %s1411_s23 = sshll.u32 %s1821_s18, 5  ;;  %s1413_s24 = sshll.u32 %s1825_s19, 5 }
  0x2f   : > { %p249_p9 = scmp.lt.s32.totalorder %s1411_s23, 63  ;;  %p255_p10 = scmp.lt.s32.totalorder %s1413_s24, 63 }
  0x30   : > { %p1415_p7 = scmp.ne.s32.totalorder %s1821_s18, 0 }
  0x31   : > { %s2544_s23 = smov (!%p249_p9, %s1411_s23), 63  ;;  %s2546_s24 = smov (!%p255_p10, %s1413_s24), 63 }
  0x32   : > { %s1412_s13 = sshll.u32 %s2544_s23, 3  ;;  %s1414_s5 = sshll.u32 %s2546_s24, 3 }
  0x33   : > { %s1969_s26 = scalar_lea.vmem %s2520_s1, %s1412_s13  ;;  %s1974_s29 = scalar_lea.vmem %s2523_s4, %s1414_s5 }
  0x34   : > { %263 = sbr.rel (%p1415_p7) target bundleno = 74 (0x4a), region = 44 }
  0x39   : > { %vm264_vm0 = vcmask 261120   ;;  %v1843_v0 = vmov 0.0  }
  0x3a   : > { %265 = vst.msk [vmem:[#allocation2] sm:$0xff] %vm264_vm0, %v1843_v0  ;;  %266 = vst.msk [vmem:[#allocation2 + $0x8] sm:$0xff] %vm264_vm0, %v1843_v0 }
  0x3b   : > { %267 = vst.msk [vmem:[#allocation2 + $0x10] sm:$0xff] %vm264_vm0, %v1843_v0  ;;  %268 = vst.msk [vmem:[#allocation2 + $0x18] sm:$0xff] %vm264_vm0, %v1843_v0 }
  0x3c   : > { %269 = vst.msk [vmem:[#allocation2 + $0x20] sm:$0xff] %vm264_vm0, %v1843_v0  ;;  %270 = vst.msk [vmem:[#allocation2 + $0x28] sm:$0xff] %vm264_vm0, %v1843_v0 }
  0x3d   : > { %271 = vst.msk [vmem:[#allocation2 + $0x30] sm:$0xff] %vm264_vm0, %v1843_v0  ;;  %272 = vst.msk [vmem:[#allocation2 + $0x38] sm:$0xff] %vm264_vm0, %v1843_v0 }
  0x3e   : > { %273 = vst.msk [vmem:[#allocation2 + $0x40] sm:$0xff] %vm264_vm0, %v1843_v0  ;;  %274 = vst.msk [vmem:[#allocation2 + $0x48] sm:$0xff] %vm264_vm0, %v1843_v0 }
  0x3f   : > { %275 = vst.msk [vmem:[#allocation2 + $0x50] sm:$0xff] %vm264_vm0, %v1843_v0  ;;  %276 = vst.msk [vmem:[#allocation2 + $0x58] sm:$0xff] %vm264_vm0, %v1843_v0 }
  0x40   : > { %277 = vst.msk [vmem:[#allocation2 + $0x60] sm:$0xff] %vm264_vm0, %v1843_v0  ;;  %278 = vst.msk [vmem:[#allocation2 + $0x68] sm:$0xff] %vm264_vm0, %v1843_v0 }
  0x41   : > { %279 = vst.msk [vmem:[#allocation2 + $0x70] sm:$0xff] %vm264_vm0, %v1843_v0  ;;  %280 = vst.msk [vmem:[#allocation2 + $0x78] sm:$0xff] %vm264_vm0, %v1843_v0 }
  0x42   : > { %281 = vst.msk [vmem:[#allocation2 + $0x80] sm:$0xff] %vm264_vm0, %v1843_v0  ;;  %282 = vst.msk [vmem:[#allocation2 + $0x88] sm:$0xff] %vm264_vm0, %v1843_v0 }
  0x43   : > { %283 = vst.msk [vmem:[#allocation2 + $0x90] sm:$0xff] %vm264_vm0, %v1843_v0  ;;  %284 = vst.msk [vmem:[#allocation2 + $0x98] sm:$0xff] %vm264_vm0, %v1843_v0 }
  0x44   : > { %285 = vst.msk [vmem:[#allocation2 + $0xa0] sm:$0xff] %vm264_vm0, %v1843_v0  ;;  %286 = vst.msk [vmem:[#allocation2 + $0xa8] sm:$0xff] %vm264_vm0, %v1843_v0 }
  0x45   : > { %287 = vst.msk [vmem:[#allocation2 + $0xb0] sm:$0xff] %vm264_vm0, %v1843_v0  ;;  %288 = vst.msk [vmem:[#allocation2 + $0xb8] sm:$0xff] %vm264_vm0, %v1843_v0 }
  0x46   : > { %289 = vst.msk [vmem:[#allocation2 + $0xc0] sm:$0xff] %vm264_vm0, %v1843_v0  ;;  %290 = vst.msk [vmem:[#allocation2 + $0xc8] sm:$0xff] %vm264_vm0, %v1843_v0 }
  0x47   : > { %291 = vst.msk [vmem:[#allocation2 + $0xd0] sm:$0xff] %vm264_vm0, %v1843_v0  ;;  %292 = vst.msk [vmem:[#allocation2 + $0xd8] sm:$0xff] %vm264_vm0, %v1843_v0 }
  0x48   : > { %293 = vst.msk [vmem:[#allocation2 + $0xe0] sm:$0xff] %vm264_vm0, %v1843_v0  ;;  %294 = vst.msk [vmem:[#allocation2 + $0xe8] sm:$0xff] %vm264_vm0, %v1843_v0 }
  0x49   : > { %295 = vst.msk [vmem:[#allocation2 + $0xf0] sm:$0xff] %vm264_vm0, %v1843_v0  ;;  %296 = vst.msk [vmem:[#allocation2 + $0xf8] sm:$0xff] %vm264_vm0, %v1843_v0 }
  0x4a PF: > { %v330_v1 = vld [vmem:[%s2521_s2 + $0x8] sm:$0xff]  ;;  %v329_v2 = vld [vmem:[%s2521_s2] sm:$0xff]  ;;  %vm331_vm1 = vcmask 130048   ;;  %v299_v5 = vld [vmem:[%s1969_s26 + $0x10] sm:$0xff]  ;;  %v1844_v35 = vmov 0.0   ;;  %vm1006_vm2 = vcmask 261120  }
  0x4b   : > { %v297_v3 = vld [vmem:[%s1969_s26] sm:$0xff]  ;;  %1487 = vmatprep.subr.mxu0 %v330_v1  ;;  %v298_v4 = vld [vmem:[%s1969_s26 + $0x8] sm:$0xff]  ;;  %v300_v6 = vld [vmem:[%s1969_s26 + $0x18] sm:$0xff]  ;;  %1539 = vmatprep.subr.mxu1 %v1844_v35  ;;  %p1448_p11 = scmp.ne.s32.totalorder %s1821_s18, 1 }
  0x4c   : > { %1491 = vmatprep.mubr.msk.f32.mxu0 %vm331_vm1, %v297_v3  ;;  %1488 = vmatpush3.msra.mxu0 %v330_v1  ;;  %v301_v7 = vld [vmem:[%s1969_s26 + $0x20] sm:$0xff]  ;;  %v302_v8 = vld [vmem:[%s1969_s26 + $0x28] sm:$0xff]  ;;  %v303_v9 = vld [vmem:[%s1969_s26 + $0x30] sm:$0xff] }
  0x4d   : > { %1489 = vmatprep.subr.mxu0 %v329_v2  ;;  %v304_v10 = vld [vmem:[%s1969_s26 + $0x38] sm:$0xff]  ;;  %v305_v11 = vld [vmem:[%s1969_s26 + $0x40] sm:$0xff]  ;;  %v306_v12 = vld [vmem:[%s1969_s26 + $0x48] sm:$0xff] }
  0x4e   : > { %1490 = vmatpush3.msra.mxu0 %v329_v2  ;;  %v307_v13 = vld [vmem:[%s1969_s26 + $0x50] sm:$0xff]  ;;  %v308_v14 = vld [vmem:[%s1969_s26 + $0x58] sm:$0xff]  ;;  %v309_v15 = vld [vmem:[%s1969_s26 + $0x60] sm:$0xff] }
  0x4f   : > { %1492 = vmatmul.mubr.msk.f32.vlgmr.msra.gmra.mxu0 %vm331_vm1, %v298_v4  ;;  %v310_v16 = vld [vmem:[%s1969_s26 + $0x68] sm:$0xff]  ;;  %v311_v17 = vld [vmem:[%s1969_s26 + $0x70] sm:$0xff]  ;;  %v312_v18 = vld [vmem:[%s1969_s26 + $0x78] sm:$0xff]  ;;  %749 = vmatprep.subr.mxu0 %v1844_v35 }
  0x50   : > { %1494 = vmatprep.mubr.msk.f32.mxu0 %vm331_vm1, %v299_v5  ;;  %v313_v19 = vld [vmem:[%s1969_s26 + $0x80] sm:$0xff]  ;;  %v314_v20 = vld [vmem:[%s1969_s26 + $0x88] sm:$0xff]  ;;  %v315_v21 = vld [vmem:[%s1969_s26 + $0x90] sm:$0xff] }
  0x51   : > { %v316_v22 = vld [vmem:[%s1969_s26 + $0x98] sm:$0xff]  ;;  %v317_v23 = vld [vmem:[%s1969_s26 + $0xa0] sm:$0xff]  ;;  %v318_v24 = vld [vmem:[%s1969_s26 + $0xa8] sm:$0xff] }
  0x52   : > { %v319_v25 = vld [vmem:[%s1969_s26 + $0xb0] sm:$0xff]  ;;  %v320_v26 = vld [vmem:[%s1969_s26 + $0xb8] sm:$0xff]  ;;  %v321_v27 = vld [vmem:[%s1969_s26 + $0xc0] sm:$0xff] }
  0x53   : > { %1495 = vmatmul.mubr.msk.f32.gmra.mxu0 %vm331_vm1, %v300_v6  ;;  %v322_v28 = vld [vmem:[%s1969_s26 + $0xc8] sm:$0xff]  ;;  %v323_v29 = vld [vmem:[%s1969_s26 + $0xd0] sm:$0xff]  ;;  %v324_v30 = vld [vmem:[%s1969_s26 + $0xd8] sm:$0xff] }
  0x54   : > { %1497 = vmatprep.mubr.msk.f32.mxu0 %vm331_vm1, %v301_v7  ;;  %v325_v31 = vld [vmem:[%s1969_s26 + $0xe0] sm:$0xff]  ;;  %v326_v32 = vld [vmem:[%s1969_s26 + $0xe8] sm:$0xff]  ;;  %v327_v33 = vld [vmem:[%s1969_s26 + $0xf0] sm:$0xff] }
  0x55   : > { %v328_v34 = vld [vmem:[%s1969_s26 + $0xf8] sm:$0xff]  ;;  %v686_v37 = vld [vmem:[%s1958_s15 + $0x8] sm:$0xff]  ;;  %v715_v6 = vld [vmem:[%s1958_s15 + $0xf0] sm:$0xff] }
  0x56   : > { %v716_v36 = vld [vmem:[%s1958_s15 + $0xf8] sm:$0xff]  ;;  %v685_v7 = vld [vmem:[%s1958_s15] sm:$0xff] }
  0x57   : > { %1498 = vmatmul.mubr.msk.f32.gmra.mxu0 %vm331_vm1, %v302_v8  ;;  %888 = vmatprep.mubr.f32.mxu1 %v716_v36  ;;  %v718_v8 = vld [vmem:[%s1958_s15 + $0x108] sm:$0xff]  ;;  %v732_v36 = vld [vmem:[%s1958_s15 + $0x178] sm:$0xff] }
  0x58   : > { %1500 = vmatprep.mubr.msk.f32.mxu0 %vm331_vm1, %v303_v9  ;;  %v688_v9 = vld [vmem:[%s1958_s15 + $0x18] sm:$0xff] }
  0x5b   : > { %1501 = vmatmul.mubr.msk.f32.gmra.mxu0 %vm331_vm1, %v304_v10  ;;  %v717_v10 = vld [vmem:[%s1958_s15 + $0x100] sm:$0xff] }
  0x5c   : > { %1503 = vmatprep.mubr.msk.f32.mxu0 %vm331_vm1, %v305_v11  ;;  %v687_v11 = vld [vmem:[%s1958_s15 + $0x10] sm:$0xff] }
  0x5f   : > { %1504 = vmatmul.mubr.msk.f32.gmra.mxu0 %vm331_vm1, %v306_v12  ;;  %v720_v12 = vld [vmem:[%s1958_s15 + $0x118] sm:$0xff] }
  0x60   : > { %1506 = vmatprep.mubr.msk.f32.mxu0 %vm331_vm1, %v307_v13  ;;  %v690_v13 = vld [vmem:[%s1958_s15 + $0x28] sm:$0xff] }
  0x63   : > { %1507 = vmatmul.mubr.msk.f32.gmra.mxu0 %vm331_vm1, %v308_v14  ;;  %v719_v14 = vld [vmem:[%s1958_s15 + $0x110] sm:$0xff] }
  0x64   : > { %1509 = vmatprep.mubr.msk.f32.mxu0 %vm331_vm1, %v309_v15  ;;  %v689_v15 = vld [vmem:[%s1958_s15 + $0x20] sm:$0xff] }
  0x67   : > { %1510 = vmatmul.mubr.msk.f32.gmra.mxu0 %vm331_vm1, %v310_v16  ;;  %v722_v16 = vld [vmem:[%s1958_s15 + $0x128] sm:$0xff] }
  0x68   : > { %1512 = vmatprep.mubr.msk.f32.mxu0 %vm331_vm1, %v311_v17  ;;  %v692_v17 = vld [vmem:[%s1958_s15 + $0x38] sm:$0xff] }
  0x6b   : > { %1513 = vmatmul.mubr.msk.f32.gmra.mxu0 %vm331_vm1, %v312_v18  ;;  %v721_v18 = vld [vmem:[%s1958_s15 + $0x120] sm:$0xff] }
  0x6c   : > { %1515 = vmatprep.mubr.msk.f32.mxu0 %vm331_vm1, %v313_v19  ;;  %v691_v19 = vld [vmem:[%s1958_s15 + $0x30] sm:$0xff] }
  0x6f   : > { %1516 = vmatmul.mubr.msk.f32.gmra.mxu0 %vm331_vm1, %v314_v20  ;;  %v724_v20 = vld [vmem:[%s1958_s15 + $0x138] sm:$0xff] }
  0x70   : > { %1518 = vmatprep.mubr.msk.f32.mxu0 %vm331_vm1, %v315_v21  ;;  %v694_v21 = vld [vmem:[%s1958_s15 + $0x48] sm:$0xff] }
  0x73   : > { %1519 = vmatmul.mubr.msk.f32.gmra.mxu0 %vm331_vm1, %v316_v22  ;;  %v723_v22 = vld [vmem:[%s1958_s15 + $0x130] sm:$0xff] }
  0x74   : > { %1521 = vmatprep.mubr.msk.f32.mxu0 %vm331_vm1, %v317_v23  ;;  %v693_v23 = vld [vmem:[%s1958_s15 + $0x40] sm:$0xff] }
  0x77   : > { %1522 = vmatmul.mubr.msk.f32.gmra.mxu0 %vm331_vm1, %v318_v24  ;;  %v726_v24 = vld [vmem:[%s1958_s15 + $0x148] sm:$0xff] }
  0x78   : > { %1524 = vmatprep.mubr.msk.f32.mxu0 %vm331_vm1, %v319_v25  ;;  %v696_v25 = vld [vmem:[%s1958_s15 + $0x58] sm:$0xff] }
  0x7b   : > { %1525 = vmatmul.mubr.msk.f32.gmra.mxu0 %vm331_vm1, %v320_v26  ;;  %v725_v26 = vld [vmem:[%s1958_s15 + $0x140] sm:$0xff] }
  0x7c   : > { %1527 = vmatprep.mubr.msk.f32.mxu0 %vm331_vm1, %v321_v27  ;;  %v695_v27 = vld [vmem:[%s1958_s15 + $0x50] sm:$0xff] }
  0x7f   : > { %1528 = vmatmul.mubr.msk.f32.gmra.mxu0 %vm331_vm1, %v322_v28  ;;  %v728_v28 = vld [vmem:[%s1958_s15 + $0x158] sm:$0xff] }
  0x80   : > { %1530 = vmatprep.mubr.msk.f32.mxu0 %vm331_vm1, %v323_v29  ;;  %v698_v29 = vld [vmem:[%s1958_s15 + $0x68] sm:$0xff] }
  0x83   : > { %1531 = vmatmul.mubr.msk.f32.gmra.mxu0 %vm331_vm1, %v324_v30  ;;  %v727_v30 = vld [vmem:[%s1958_s15 + $0x150] sm:$0xff] }
  0x84   : > { %1533 = vmatprep.mubr.msk.f32.mxu0 %vm331_vm1, %v325_v31  ;;  %v697_v31 = vld [vmem:[%s1958_s15 + $0x60] sm:$0xff] }
  0x87   : > { %1534 = vmatmul.mubr.msk.f32.gmra.mxu0 %vm331_vm1, %v326_v32  ;;  %v730_v32 = vld [vmem:[%s1958_s15 + $0x168] sm:$0xff] }
  0x88   : > { %1536 = vmatprep.mubr.msk.f32.mxu0 %vm331_vm1, %v327_v33  ;;  %v700_v33 = vld [vmem:[%s1958_s15 + $0x78] sm:$0xff] }
  0x8b   : > { %1537 = vmatmul.mubr.msk.f32.gmra.mxu0 %vm331_vm1, %v328_v34  ;;  %v729_v34 = vld [vmem:[%s1958_s15 + $0x160] sm:$0xff] }
  0x8c   : > { %813 = vmatprep.mubr.f32.mxu0 %v686_v37  ;;  %v702_v37 = vld [vmem:[%s1958_s15 + $0x88] sm:$0xff] }
 0x10f   : > { %v2083_v38 = vpop.f32.mrf.mxu0 }
 0x111   : > { %v2085_v39 = vpop.f32.mrf.mxu0 }
 0x113   : > { %v2087_v40 = vpop.f32.mrf.mxu0 }
 0x115   : > { %v2089_v41 = vpop.f32.mrf.mxu0 }
 0x117   : > { %v1499_v42 = vpop.f32.mrf.mxu0 }
 0x119   : > { %v2091_v43 = vpop.f32.mrf.mxu0 }
 0x11b   : > { %v1502_v44 = vpop.f32.mrf.mxu0 }
 0x11d   : > { %v524_v45 = vpop.f32.mrf.mxu0 }
 0x11f   : > { %v1505_v46 = vpop.f32.mrf.mxu0 }
 0x121   : > { %v534_v47 = vpop.f32.mrf.mxu0 }
 0x123   : > { %v1508_v48 = vpop.f32.mrf.mxu0 }
 0x125   : > { %v544_v49 = vpop.f32.mrf.mxu0 }
 0x127   : > { %v1511_v50 = vpop.f32.mrf.mxu0 }
 0x129   : > { %v554_v51 = vpop.f32.mrf.mxu0 }
 0x12b   : > { %v1514_v52 = vpop.f32.mrf.mxu0 }
 0x12c   : > { %750 = vmatpush1.msra.mxu0 %v1514_v52  ;;  %1571 = vmatpush1.msra.mxu1 %v1514_v52  ;;  %v740_v52 = vld [vmem:[%s1958_s15 + $0x1b8] sm:$0xff] }
 0x12d   : > { %v564_v53 = vpop.f32.mrf.mxu0  ;;  %751 = vmatprep.subr.mxu0 %v1844_v35  ;;  %1540 = vmatprep.subr.mxu1 %v1844_v35 }
 0x12e   : > { %752 = vmatpush1.msra.mxu0 %v564_v53  ;;  %1572 = vmatpush1.msra.mxu1 %v564_v53  ;;  %v710_v53 = vld [vmem:[%s1958_s15 + $0xc8] sm:$0xff] }
 0x12f   : > { %v2095_v54 = vpop.f32.mrf.mxu0  ;;  %753 = vmatprep.subr.mxu0 %v1844_v35  ;;  %1541 = vmatprep.subr.mxu1 %v1844_v35 }
 0x130   : > { %754 = vmatpush1.msra.mxu0 %v1511_v50  ;;  %1573 = vmatpush1.msra.mxu1 %v1511_v50  ;;  %v737_v50 = vld [vmem:[%s1958_s15 + $0x1a0] sm:$0xff] }
 0x131   : > { %v2099_v55 = vpop.f32.mrf.mxu0  ;;  %755 = vmatprep.subr.mxu0 %v1844_v35  ;;  %1542 = vmatprep.subr.mxu1 %v1844_v35 }
 0x132   : > { %756 = vmatpush1.msra.mxu0 %v554_v51  ;;  %1574 = vmatpush1.msra.mxu1 %v554_v51  ;;  %v707_v51 = vld [vmem:[%s1958_s15 + $0xb0] sm:$0xff] }
 0x133   : > { %v2103_v56 = vpop.f32.mrf.mxu0  ;;  %757 = vmatprep.subr.mxu0 %v1844_v35  ;;  %1543 = vmatprep.subr.mxu1 %v1844_v35 }
 0x134   : > { %758 = vmatpush1.msra.mxu0 %v1508_v48  ;;  %1575 = vmatpush1.msra.mxu1 %v1508_v48  ;;  %v738_v48 = vld [vmem:[%s1958_s15 + $0x1a8] sm:$0xff] }
 0x135   : > { %v2107_v57 = vpop.f32.mrf.mxu0  ;;  %759 = vmatprep.subr.mxu0 %v1844_v35  ;;  %1544 = vmatprep.subr.mxu1 %v1844_v35 }
 0x136   : > { %760 = vmatpush1.msra.mxu0 %v544_v49  ;;  %1576 = vmatpush1.msra.mxu1 %v544_v49  ;;  %v708_v49 = vld [vmem:[%s1958_s15 + $0xb8] sm:$0xff] }
 0x137   : > { %v2111_v58 = vpop.f32.mrf.mxu0  ;;  %761 = vmatprep.subr.mxu0 %v1844_v35  ;;  %1545 = vmatprep.subr.mxu1 %v1844_v35 }
 0x138   : > { %762 = vmatpush1.msra.mxu0 %v1505_v46  ;;  %1577 = vmatpush1.msra.mxu1 %v1505_v46  ;;  %v735_v46 = vld [vmem:[%s1958_s15 + $0x190] sm:$0xff] }
 0x139   : > { %v2115_v59 = vpop.f32.mrf.mxu0  ;;  %763 = vmatprep.subr.mxu0 %v1844_v35  ;;  %1546 = vmatprep.subr.mxu1 %v1844_v35 }
 0x13a   : > { %764 = vmatpush1.msra.mxu0 %v534_v47  ;;  %1578 = vmatpush1.msra.mxu1 %v534_v47  ;;  %v705_v47 = vld [vmem:[%s1958_s15 + $0xa0] sm:$0xff] }
 0x13b   : > { %v2119_v60 = vpop.f32.mrf.mxu0  ;;  %765 = vmatprep.subr.mxu0 %v1844_v35  ;;  %1547 = vmatprep.subr.mxu1 %v1844_v35 }
 0x13c   : > { %766 = vmatpush1.msra.mxu0 %v1502_v44  ;;  %1579 = vmatpush1.msra.mxu1 %v1502_v44  ;;  %v736_v44 = vld [vmem:[%s1958_s15 + $0x198] sm:$0xff] }
 0x13d   : > { %v2123_v61 = vpop.f32.mrf.mxu0  ;;  %767 = vmatprep.subr.mxu0 %v1844_v35  ;;  %1548 = vmatprep.subr.mxu1 %v1844_v35 }
 0x13e   : > { %768 = vmatpush1.msra.mxu0 %v524_v45  ;;  %1580 = vmatpush1.msra.mxu1 %v524_v45  ;;  %v706_v45 = vld [vmem:[%s1958_s15 + $0xa8] sm:$0xff] }
 0x13f   : > { %v1529_v62 = vpop.f32.mrf.mxu0  ;;  %769 = vmatprep.subr.mxu0 %v1844_v35  ;;  %1549 = vmatprep.subr.mxu1 %v1844_v35 }
 0x140   : > { %770 = vmatpush1.msra.mxu0 %v1499_v42  ;;  %1581 = vmatpush1.msra.mxu1 %v1499_v42  ;;  %v733_v42 = vld [vmem:[%s1958_s15 + $0x180] sm:$0xff] }
 0x141   : > { %v614_v63 = vpop.f32.mrf.mxu0  ;;  %771 = vmatprep.subr.mxu0 %v1844_v35  ;;  %1550 = vmatprep.subr.mxu1 %v1844_v35 }
 0x142   : > { %772 = vmatpush1.msra.mxu0 %v2091_v43  ;;  %1582 = vmatpush1.msra.mxu1 %v2091_v43  ;;  %v703_v43 = vld [vmem:[%s1958_s15 + $0x90] sm:$0xff] }
 0x143   : > { %v1532_v0 = vpop.f32.mrf.mxu0  ;;  %773 = vmatprep.subr.mxu0 %v1844_v35  ;;  %1551 = vmatprep.subr.mxu1 %v1844_v35 }
 0x144   : > { %774 = vmatpush1.msra.mxu0 %v2087_v40  ;;  %1583 = vmatpush1.msra.mxu1 %v2087_v40  ;;  %v734_v40 = vld [vmem:[%s1958_s15 + $0x188] sm:$0xff] }
 0x145   : > { %v624_v1 = vpop.f32.mrf.mxu0  ;;  %775 = vmatprep.subr.mxu0 %v1844_v35  ;;  %1552 = vmatprep.subr.mxu1 %v1844_v35 }
 0x146   : > { %776 = vmatpush1.msra.mxu0 %v2089_v41  ;;  %1584 = vmatpush1.msra.mxu1 %v2089_v41  ;;  %v704_v41 = vld [vmem:[%s1958_s15 + $0x98] sm:$0xff] }
 0x147   : > { %v1535_v2 = vpop.f32.mrf.mxu0  ;;  %777 = vmatprep.subr.mxu0 %v1844_v35  ;;  %1553 = vmatprep.subr.mxu1 %v1844_v35 }
 0x148   : > { %778 = vmatpush1.msra.mxu0 %v2083_v38  ;;  %1585 = vmatpush1.msra.mxu1 %v2083_v38  ;;  %v731_v38 = vld [vmem:[%s1958_s15 + $0x170] sm:$0xff] }
 0x149   : > { %v634_v3 = vpop.f32.mrf.mxu0  ;;  %779 = vmatprep.subr.mxu0 %v1844_v35  ;;  %1554 = vmatprep.subr.mxu1 %v1844_v35 }
 0x14a   : > { %780 = vmatpush1.msra.mxu0 %v2085_v39  ;;  %1586 = vmatpush1.msra.mxu1 %v2085_v39  ;;  %v701_v39 = vld [vmem:[%s1958_s15 + $0x80] sm:$0xff] }
 0x14b   : > { %v1538_v4 = vpop.f32.mrf.mxu0  ;;  %781 = vmatprep.subr.mxu0 %v1844_v35  ;;  %1555 = vmatprep.subr.mxu1 %v1844_v35 }
 0x14c   : > { %782 = vmatpush2.msra.mxu0 %v1538_v4  ;;  %1587 = vmatpush2.msra.mxu1 %v1538_v4  ;;  %v668_v4 = vld [vmem:[#allocation2 + $0x78] sm:$0xff] }
 0x14d   : > { %v644_v5 = vpop.f32.mrf.mxu0  ;;  %783 = vmatprep.subr.mxu0 %v1844_v35  ;;  %1556 = vmatprep.subr.mxu1 %v1844_v35 }
 0x14e   : > { %784 = vmatpush2.msra.mxu0 %v644_v5  ;;  %1588 = vmatpush2.msra.mxu1 %v644_v5  ;;  %v653_v5 = vld [vmem:[#allocation2] sm:$0xff] }
 0x14f   : > { %785 = vmatprep.subr.mxu0 %v1844_v35  ;;  %1557 = vmatprep.subr.mxu1 %v1844_v35 }
 0x150   : > { %786 = vmatpush2.msra.mxu0 %v1535_v2  ;;  %1589 = vmatpush2.msra.mxu1 %v1535_v2  ;;  %v748_v2 = vld [vmem:[%s1958_s15 + $0x1f8] sm:$0xff] }
 0x151   : > { %787 = vmatprep.subr.mxu0 %v1844_v35  ;;  %1558 = vmatprep.subr.mxu1 %v1844_v35 }
 0x152   : > { %788 = vmatpush2.msra.mxu0 %v634_v3  ;;  %1590 = vmatpush2.msra.mxu1 %v634_v3  ;;  %v747_v3 = vld [vmem:[%s1958_s15 + $0x1f0] sm:$0xff] }
 0x153   : > { %789 = vmatprep.subr.mxu0 %v1844_v35  ;;  %1559 = vmatprep.subr.mxu1 %v1844_v35 }
 0x154   : > { %790 = vmatpush2.msra.mxu0 %v1532_v0  ;;  %1591 = vmatpush2.msra.mxu1 %v1532_v0  ;;  %v746_v0 = vld [vmem:[%s1958_s15 + $0x1e8] sm:$0xff] }
 0x155   : > { %791 = vmatprep.subr.mxu0 %v1844_v35  ;;  %1560 = vmatprep.subr.mxu1 %v1844_v35 }
 0x156   : > { %792 = vmatpush2.msra.mxu0 %v624_v1  ;;  %1592 = vmatpush2.msra.mxu1 %v624_v1  ;;  %v745_v1 = vld [vmem:[%s1958_s15 + $0x1e0] sm:$0xff] }
 0x157   : > { %793 = vmatprep.subr.mxu0 %v1844_v35  ;;  %1561 = vmatprep.subr.mxu1 %v1844_v35 }
 0x158   : > { %794 = vmatpush2.msra.mxu0 %v1529_v62  ;;  %1593 = vmatpush2.msra.mxu1 %v1529_v62  ;;  %v743_v62 = vld [vmem:[%s1958_s15 + $0x1d0] sm:$0xff] }
 0x159   : > { %795 = vmatprep.subr.mxu0 %v1844_v35  ;;  %1562 = vmatprep.subr.mxu1 %v1844_v35 }
 0x15a   : > { %796 = vmatpush2.msra.mxu0 %v614_v63  ;;  %1594 = vmatpush2.msra.mxu1 %v614_v63  ;;  %v713_v63 = vld [vmem:[%s1958_s15 + $0xe0] sm:$0xff] }
 0x15b   : > { %797 = vmatprep.subr.mxu0 %v1844_v35  ;;  %1563 = vmatprep.subr.mxu1 %v1844_v35 }
 0x15c   : > { %798 = vmatpush2.msra.mxu0 %v2119_v60  ;;  %1595 = vmatpush2.msra.mxu1 %v2119_v60  ;;  %v744_v60 = vld [vmem:[%s1958_s15 + $0x1d8] sm:$0xff] }
 0x15d   : > { %799 = vmatprep.subr.mxu0 %v1844_v35  ;;  %1564 = vmatprep.subr.mxu1 %v1844_v35 }
 0x15e   : > { %800 = vmatpush2.msra.mxu0 %v2123_v61  ;;  %1596 = vmatpush2.msra.mxu1 %v2123_v61  ;;  %v714_v61 = vld [vmem:[%s1958_s15 + $0xe8] sm:$0xff] }
 0x15f   : > { %801 = vmatprep.subr.mxu0 %v1844_v35  ;;  %1565 = vmatprep.subr.mxu1 %v1844_v35 }
 0x160   : > { %802 = vmatpush2.msra.mxu0 %v2111_v58  ;;  %1597 = vmatpush2.msra.mxu1 %v2111_v58  ;;  %v741_v58 = vld [vmem:[%s1958_s15 + $0x1c0] sm:$0xff] }
 0x161   : > { %803 = vmatprep.subr.mxu0 %v1844_v35  ;;  %1566 = vmatprep.subr.mxu1 %v1844_v35 }
 0x162   : > { %804 = vmatpush2.msra.mxu0 %v2115_v59  ;;  %1598 = vmatpush2.msra.mxu1 %v2115_v59  ;;  %v711_v59 = vld [vmem:[%s1958_s15 + $0xd0] sm:$0xff] }
 0x163   : > { %805 = vmatprep.subr.mxu0 %v1844_v35  ;;  %1567 = vmatprep.subr.mxu1 %v1844_v35 }
 0x164   : > { %806 = vmatpush2.msra.mxu0 %v2103_v56  ;;  %1599 = vmatpush2.msra.mxu1 %v2103_v56  ;;  %v742_v56 = vld [vmem:[%s1958_s15 + $0x1c8] sm:$0xff] }
 0x165   : > { %807 = vmatprep.subr.mxu0 %v1844_v35  ;;  %1568 = vmatprep.subr.mxu1 %v1844_v35 }
 0x166   : > { %808 = vmatpush2.msra.mxu0 %v2107_v57  ;;  %1600 = vmatpush2.msra.mxu1 %v2107_v57  ;;  %v712_v57 = vld [vmem:[%s1958_s15 + $0xd8] sm:$0xff] }
 0x167   : > { %809 = vmatprep.subr.mxu0 %v1844_v35  ;;  %1569 = vmatprep.subr.mxu1 %v1844_v35 }
 0x168   : > { %810 = vmatpush2.msra.mxu0 %v2095_v54  ;;  %1601 = vmatpush2.msra.mxu1 %v2095_v54  ;;  %v739_v54 = vld [vmem:[%s1958_s15 + $0x1b0] sm:$0xff] }
 0x169   : > { %811 = vmatprep.subr.mxu0 %v1844_v35  ;;  %1570 = vmatprep.subr.mxu1 %v1844_v35  ;;  %v699_v35 = vld [vmem:[%s1958_s15 + $0x70] sm:$0xff] }
 0x16a   : > { %812 = vmatpush2.msra.mxu0 %v2099_v55  ;;  %1602 = vmatpush2.msra.mxu1 %v2099_v55  ;;  %v709_v55 = vld [vmem:[%s1958_s15 + $0xc0] sm:$0xff] }
 0x16b   : > { %889 = vmatmul.mubr.f32.vlgmr.msra.gmra.mxu1 %v715_v6  ;;  %814 = vmatmul.mubr.f32.vlgmr.msra.gmra.mxu0 %v685_v7 }
 0x16c   : > { %893 = vmatprep.mubr.f32.mxu1 %v718_v8  ;;  %818 = vmatprep.mubr.f32.mxu0 %v688_v9 }
 0x16f   : > { %894 = vmatmul.mubr.f32.gmra.mxu1 %v717_v10  ;;  %819 = vmatmul.mubr.f32.gmra.mxu0 %v687_v11  ;;  %v669_v11 = vld [vmem:[#allocation2 + $0x80] sm:$0xff] }
 0x170   : > { %898 = vmatprep.mubr.f32.mxu1 %v720_v12  ;;  %823 = vmatprep.mubr.f32.mxu0 %v690_v13  ;;  %v654_v13 = vld [vmem:[#allocation2 + $0x8] sm:$0xff] }
 0x173   : > { %899 = vmatmul.mubr.f32.gmra.mxu1 %v719_v14  ;;  %824 = vmatmul.mubr.f32.gmra.mxu0 %v689_v15 }
 0x174   : > { %903 = vmatprep.mubr.f32.mxu1 %v722_v16  ;;  %828 = vmatprep.mubr.f32.mxu0 %v692_v17 }
 0x177   : > { %904 = vmatmul.mubr.f32.gmra.mxu1 %v721_v18  ;;  %829 = vmatmul.mubr.f32.gmra.mxu0 %v691_v19  ;;  %v670_v19 = vld [vmem:[#allocation2 + $0x88] sm:$0xff] }
 0x178   : > { %908 = vmatprep.mubr.f32.mxu1 %v724_v20  ;;  %833 = vmatprep.mubr.f32.mxu0 %v694_v21  ;;  %v655_v21 = vld [vmem:[#allocation2 + $0x10] sm:$0xff] }
 0x17b   : > { %909 = vmatmul.mubr.f32.gmra.mxu1 %v723_v22  ;;  %834 = vmatmul.mubr.f32.gmra.mxu0 %v693_v23 }
 0x17c   : > { %913 = vmatprep.mubr.f32.mxu1 %v726_v24  ;;  %838 = vmatprep.mubr.f32.mxu0 %v696_v25 }
 0x17f   : > { %914 = vmatmul.mubr.f32.gmra.mxu1 %v725_v26  ;;  %839 = vmatmul.mubr.f32.gmra.mxu0 %v695_v27  ;;  %v671_v27 = vld [vmem:[#allocation2 + $0x90] sm:$0xff] }
 0x180   : > { %918 = vmatprep.mubr.f32.mxu1 %v728_v28  ;;  %843 = vmatprep.mubr.f32.mxu0 %v698_v29  ;;  %v656_v29 = vld [vmem:[#allocation2 + $0x18] sm:$0xff] }
 0x183   : > { %919 = vmatmul.mubr.f32.gmra.mxu1 %v727_v30  ;;  %844 = vmatmul.mubr.f32.gmra.mxu0 %v697_v31 }
 0x184   : > { %923 = vmatprep.mubr.f32.mxu1 %v730_v32  ;;  %848 = vmatprep.mubr.f32.mxu0 %v700_v33 }
 0x187   : > { %924 = vmatmul.mubr.f32.gmra.mxu1 %v729_v34  ;;  %849 = vmatmul.mubr.f32.gmra.mxu0 %v699_v35  ;;  %v672_v35 = vld [vmem:[#allocation2 + $0x98] sm:$0xff] }
 0x188   : > { %928 = vmatprep.mubr.f32.mxu1 %v732_v36  ;;  %853 = vmatprep.mubr.f32.mxu0 %v702_v37  ;;  %v657_v37 = vld [vmem:[#allocation2 + $0x20] sm:$0xff] }
 0x18b   : > { %929 = vmatmul.mubr.f32.gmra.mxu1 %v731_v38  ;;  %854 = vmatmul.mubr.f32.gmra.mxu0 %v701_v39 }
 0x18c   : > { %933 = vmatprep.mubr.f32.mxu1 %v734_v40  ;;  %858 = vmatprep.mubr.f32.mxu0 %v704_v41 }
 0x18f   : > { %934 = vmatmul.mubr.f32.gmra.mxu1 %v733_v42  ;;  %859 = vmatmul.mubr.f32.gmra.mxu0 %v703_v43  ;;  %v673_v43 = vld [vmem:[#allocation2 + $0xa0] sm:$0xff] }
 0x190   : > { %938 = vmatprep.mubr.f32.mxu1 %v736_v44  ;;  %863 = vmatprep.mubr.f32.mxu0 %v706_v45  ;;  %v658_v45 = vld [vmem:[#allocation2 + $0x28] sm:$0xff] }
 0x193   : > { %939 = vmatmul.mubr.f32.gmra.mxu1 %v735_v46  ;;  %864 = vmatmul.mubr.f32.gmra.mxu0 %v705_v47 }
 0x194   : > { %943 = vmatprep.mubr.f32.mxu1 %v738_v48  ;;  %868 = vmatprep.mubr.f32.mxu0 %v708_v49 }
 0x197   : > { %944 = vmatmul.mubr.f32.gmra.mxu1 %v737_v50  ;;  %869 = vmatmul.mubr.f32.gmra.mxu0 %v707_v51  ;;  %v674_v51 = vld [vmem:[#allocation2 + $0xa8] sm:$0xff] }
 0x198   : > { %948 = vmatprep.mubr.f32.mxu1 %v740_v52  ;;  %873 = vmatprep.mubr.f32.mxu0 %v710_v53  ;;  %v659_v53 = vld [vmem:[#allocation2 + $0x30] sm:$0xff] }
 0x19b   : > { %949 = vmatmul.mubr.f32.gmra.mxu1 %v739_v54  ;;  %874 = vmatmul.mubr.f32.gmra.mxu0 %v709_v55 }
 0x19c   : > { %953 = vmatprep.mubr.f32.mxu1 %v742_v56  ;;  %878 = vmatprep.mubr.f32.mxu0 %v712_v57 }
 0x19f   : > { %954 = vmatmul.mubr.f32.gmra.mxu1 %v741_v58  ;;  %879 = vmatmul.mubr.f32.gmra.mxu0 %v711_v59  ;;  %v675_v59 = vld [vmem:[#allocation2 + $0xb0] sm:$0xff] }
 0x1a0   : > { %958 = vmatprep.mubr.f32.mxu1 %v744_v60  ;;  %883 = vmatprep.mubr.f32.mxu0 %v714_v61  ;;  %v660_v61 = vld [vmem:[#allocation2 + $0x38] sm:$0xff] }
 0x1a3   : > { %959 = vmatmul.mubr.f32.gmra.mxu1 %v743_v62  ;;  %884 = vmatmul.mubr.f32.gmra.mxu0 %v713_v63 }
 0x1a4   : > { %963 = vmatprep.mubr.f32.mxu1 %v746_v0 }
 0x1a7   : > { %964 = vmatmul.mubr.f32.gmra.mxu1 %v745_v1 }
 0x1a8   : > { %968 = vmatprep.mubr.f32.mxu1 %v748_v2 }
 0x1ab   : > { %969 = vmatmul.mubr.f32.gmra.mxu1 %v747_v3  ;;  %v676_v3 = vld [vmem:[#allocation2 + $0xb8] sm:$0xff] }
 0x22b   : > { %v890_v6 = vpop.f32.mrf.mxu1  ;;  %v815_v7 = vpop.f32.mrf.mxu0 }
 0x22c   : > { %v989_v8 = vadd.f32 %v890_v6, %v668_v4  ;;  %v974_v9 = vadd.f32 %v815_v7, %v653_v5  ;;  %v661_v5 = vld [vmem:[#allocation2 + $0x40] sm:$0xff] }
 0x22d   : > { %v892_v10 = vpop.f32.mrf.mxu1  ;;  %v817_v12 = vpop.f32.mrf.mxu0 }
 0x22e   : > { %1022 = vst.msk [vmem:[#allocation2 + $0x78] sm:$0xff] %vm1006_vm2, %v989_v8  ;;  %1007 = vst.msk [vmem:[#allocation2] sm:$0xff] %vm1006_vm2, %v974_v9 }
 0x22f   : > { %v895_v14 = vpop.f32.mrf.mxu1  ;;  %v820_v15 = vpop.f32.mrf.mxu0 }
 0x230   : > { %v990_v16 = vadd.f32 %v895_v14, %v669_v11  ;;  %v975_v17 = vadd.f32 %v820_v15, %v654_v13  ;;  %v677_v11 = vld [vmem:[#allocation2 + $0xc0] sm:$0xff]  ;;  %v662_v13 = vld [vmem:[#allocation2 + $0x48] sm:$0xff] }
 0x231   : > { %v897_v18 = vpop.f32.mrf.mxu1  ;;  %v822_v20 = vpop.f32.mrf.mxu0 }
 0x232   : > { %1023 = vst.msk [vmem:[#allocation2 + $0x80] sm:$0xff] %vm1006_vm2, %v990_v16  ;;  %1008 = vst.msk [vmem:[#allocation2 + $0x8] sm:$0xff] %vm1006_vm2, %v975_v17 }
 0x233   : > { %v900_v22 = vpop.f32.mrf.mxu1  ;;  %v825_v23 = vpop.f32.mrf.mxu0 }
 0x234   : > { %v991_v24 = vadd.f32 %v900_v22, %v670_v19  ;;  %v976_v25 = vadd.f32 %v825_v23, %v655_v21  ;;  %v678_v19 = vld [vmem:[#allocation2 + $0xc8] sm:$0xff]  ;;  %v663_v21 = vld [vmem:[#allocation2 + $0x50] sm:$0xff] }
 0x235   : > { %v902_v26 = vpop.f32.mrf.mxu1  ;;  %v827_v28 = vpop.f32.mrf.mxu0 }
 0x236   : > { %1024 = vst.msk [vmem:[#allocation2 + $0x88] sm:$0xff] %vm1006_vm2, %v991_v24  ;;  %1009 = vst.msk [vmem:[#allocation2 + $0x10] sm:$0xff] %vm1006_vm2, %v976_v25 }
 0x237   : > { %v905_v30 = vpop.f32.mrf.mxu1  ;;  %v830_v31 = vpop.f32.mrf.mxu0 }
 0x238   : > { %v992_v32 = vadd.f32 %v905_v30, %v671_v27  ;;  %v977_v33 = vadd.f32 %v830_v31, %v656_v29  ;;  %v679_v27 = vld [vmem:[#allocation2 + $0xd0] sm:$0xff]  ;;  %v664_v29 = vld [vmem:[#allocation2 + $0x58] sm:$0xff] }
 0x239   : > { %v907_v34 = vpop.f32.mrf.mxu1  ;;  %v832_v36 = vpop.f32.mrf.mxu0 }
 0x23a   : > { %1025 = vst.msk [vmem:[#allocation2 + $0x90] sm:$0xff] %vm1006_vm2, %v992_v32  ;;  %1010 = vst.msk [vmem:[#allocation2 + $0x18] sm:$0xff] %vm1006_vm2, %v977_v33 }
 0x23b   : > { %v910_v38 = vpop.f32.mrf.mxu1  ;;  %v835_v39 = vpop.f32.mrf.mxu0 }
 0x23c   : > { %v993_v40 = vadd.f32 %v910_v38, %v672_v35  ;;  %v978_v41 = vadd.f32 %v835_v39, %v657_v37  ;;  %v680_v35 = vld [vmem:[#allocation2 + $0xd8] sm:$0xff]  ;;  %v665_v37 = vld [vmem:[#allocation2 + $0x60] sm:$0xff] }
 0x23d   : > { %v912_v42 = vpop.f32.mrf.mxu1  ;;  %v837_v44 = vpop.f32.mrf.mxu0 }
 0x23e   : > { %1026 = vst.msk [vmem:[#allocation2 + $0x98] sm:$0xff] %vm1006_vm2, %v993_v40  ;;  %1011 = vst.msk [vmem:[#allocation2 + $0x20] sm:$0xff] %vm1006_vm2, %v978_v41 }
 0x23f   : > { %v915_v46 = vpop.f32.mrf.mxu1  ;;  %v840_v47 = vpop.f32.mrf.mxu0 }
 0x240   : > { %v994_v48 = vadd.f32 %v915_v46, %v673_v43  ;;  %v979_v49 = vadd.f32 %v840_v47, %v658_v45  ;;  %v681_v43 = vld [vmem:[#allocation2 + $0xe0] sm:$0xff]  ;;  %v666_v45 = vld [vmem:[#allocation2 + $0x68] sm:$0xff] }
 0x241   : > { %v917_v50 = vpop.f32.mrf.mxu1  ;;  %v842_v52 = vpop.f32.mrf.mxu0 }
 0x242   : > { %1027 = vst.msk [vmem:[#allocation2 + $0xa0] sm:$0xff] %vm1006_vm2, %v994_v48  ;;  %1012 = vst.msk [vmem:[#allocation2 + $0x28] sm:$0xff] %vm1006_vm2, %v979_v49 }
 0x243   : > { %v920_v54 = vpop.f32.mrf.mxu1  ;;  %v845_v55 = vpop.f32.mrf.mxu0 }
 0x244   : > { %v995_v56 = vadd.f32 %v920_v54, %v674_v51  ;;  %v980_v57 = vadd.f32 %v845_v55, %v659_v53  ;;  %v682_v51 = vld [vmem:[#allocation2 + $0xe8] sm:$0xff]  ;;  %v667_v53 = vld [vmem:[#allocation2 + $0x70] sm:$0xff] }
 0x245   : > { %v922_v58 = vpop.f32.mrf.mxu1  ;;  %v847_v60 = vpop.f32.mrf.mxu0 }
 0x246   : > { %1028 = vst.msk [vmem:[#allocation2 + $0xa8] sm:$0xff] %vm1006_vm2, %v995_v56  ;;  %1013 = vst.msk [vmem:[#allocation2 + $0x30] sm:$0xff] %vm1006_vm2, %v980_v57 }
 0x247   : > { %v925_v62 = vpop.f32.mrf.mxu1  ;;  %v850_v63 = vpop.f32.mrf.mxu0 }
 0x248   : > { %v996_v0 = vadd.f32 %v925_v62, %v675_v59  ;;  %v981_v1 = vadd.f32 %v850_v63, %v660_v61  ;;  %v683_v59 = vld [vmem:[#allocation2 + $0xf0] sm:$0xff] }
 0x249   : > { %v927_v2 = vpop.f32.mrf.mxu1  ;;  %v852_v4 = vpop.f32.mrf.mxu0 }
 0x24a   : > { %1029 = vst.msk [vmem:[#allocation2 + $0xb0] sm:$0xff] %vm1006_vm2, %v996_v0  ;;  %1014 = vst.msk [vmem:[#allocation2 + $0x38] sm:$0xff] %vm1006_vm2, %v981_v1  ;;  %v684_v0 = vld [vmem:[#allocation2 + $0xf8] sm:$0xff] }
 0x24b   : > { %v930_v6 = vpop.f32.mrf.mxu1  ;;  %v855_v7 = vpop.f32.mrf.mxu0 }
 0x24c   : > { %v997_v8 = vadd.f32 %v930_v6, %v676_v3  ;;  %v982_v9 = vadd.f32 %v855_v7, %v661_v5 }
 0x24d   : > { %v932_v10 = vpop.f32.mrf.mxu1  ;;  %v857_v12 = vpop.f32.mrf.mxu0 }
 0x24e   : > { %1030 = vst.msk [vmem:[#allocation2 + $0xb8] sm:$0xff] %vm1006_vm2, %v997_v8  ;;  %1015 = vst.msk [vmem:[#allocation2 + $0x40] sm:$0xff] %vm1006_vm2, %v982_v9 }
 0x24f   : > { %v935_v14 = vpop.f32.mrf.mxu1  ;;  %v860_v15 = vpop.f32.mrf.mxu0 }
 0x250   : > { %v998_v16 = vadd.f32 %v935_v14, %v677_v11  ;;  %v983_v17 = vadd.f32 %v860_v15, %v662_v13 }
 0x251   : > { %v937_v18 = vpop.f32.mrf.mxu1  ;;  %v862_v20 = vpop.f32.mrf.mxu0 }
 0x252   : > { %1031 = vst.msk [vmem:[#allocation2 + $0xc0] sm:$0xff] %vm1006_vm2, %v998_v16  ;;  %1016 = vst.msk [vmem:[#allocation2 + $0x48] sm:$0xff] %vm1006_vm2, %v983_v17 }
 0x253   : > { %v940_v22 = vpop.f32.mrf.mxu1  ;;  %v865_v23 = vpop.f32.mrf.mxu0 }
 0x254   : > { %v999_v24 = vadd.f32 %v940_v22, %v678_v19  ;;  %v984_v25 = vadd.f32 %v865_v23, %v663_v21 }
 0x255   : > { %v942_v26 = vpop.f32.mrf.mxu1  ;;  %v867_v28 = vpop.f32.mrf.mxu0 }
 0x256   : > { %1032 = vst.msk [vmem:[#allocation2 + $0xc8] sm:$0xff] %vm1006_vm2, %v999_v24  ;;  %1017 = vst.msk [vmem:[#allocation2 + $0x50] sm:$0xff] %vm1006_vm2, %v984_v25 }
 0x257   : > { %v945_v30 = vpop.f32.mrf.mxu1  ;;  %v870_v31 = vpop.f32.mrf.mxu0 }
 0x258   : > { %v1000_v32 = vadd.f32 %v945_v30, %v679_v27  ;;  %v985_v33 = vadd.f32 %v870_v31, %v664_v29 }
 0x259   : > { %v947_v34 = vpop.f32.mrf.mxu1  ;;  %v872_v36 = vpop.f32.mrf.mxu0 }
 0x25a   : > { %1033 = vst.msk [vmem:[#allocation2 + $0xd0] sm:$0xff] %vm1006_vm2, %v1000_v32  ;;  %1018 = vst.msk [vmem:[#allocation2 + $0x58] sm:$0xff] %vm1006_vm2, %v985_v33 }
 0x25b   : > { %v950_v38 = vpop.f32.mrf.mxu1  ;;  %v875_v39 = vpop.f32.mrf.mxu0 }
 0x25c   : > { %v1001_v40 = vadd.f32 %v950_v38, %v680_v35  ;;  %v986_v41 = vadd.f32 %v875_v39, %v665_v37 }
 0x25d   : > { %v952_v42 = vpop.f32.mrf.mxu1  ;;  %v877_v44 = vpop.f32.mrf.mxu0 }
 0x25e   : > { %1034 = vst.msk [vmem:[#allocation2 + $0xd8] sm:$0xff] %vm1006_vm2, %v1001_v40  ;;  %1019 = vst.msk [vmem:[#allocation2 + $0x60] sm:$0xff] %vm1006_vm2, %v986_v41 }
 0x25f   : > { %v955_v46 = vpop.f32.mrf.mxu1  ;;  %v880_v47 = vpop.f32.mrf.mxu0 }
 0x260   : > { %v1002_v48 = vadd.f32 %v955_v46, %v681_v43  ;;  %v987_v49 = vadd.f32 %v880_v47, %v666_v45 }
 0x261   : > { %v957_v50 = vpop.f32.mrf.mxu1  ;;  %v882_v52 = vpop.f32.mrf.mxu0 }
 0x262   : > { %1035 = vst.msk [vmem:[#allocation2 + $0xe0] sm:$0xff] %vm1006_vm2, %v1002_v48  ;;  %1020 = vst.msk [vmem:[#allocation2 + $0x68] sm:$0xff] %vm1006_vm2, %v987_v49 }
 0x263   : > { %v960_v54 = vpop.f32.mrf.mxu1  ;;  %v885_v55 = vpop.f32.mrf.mxu0 }
 0x264   : > { %v1003_v56 = vadd.f32 %v960_v54, %v682_v51  ;;  %v988_v57 = vadd.f32 %v885_v55, %v667_v53 }
 0x265   : > { %v962_v58 = vpop.f32.mrf.mxu1  ;;  %v887_v60 = vpop.f32.mrf.mxu0 }
 0x266   : > { %1036 = vst.msk [vmem:[#allocation2 + $0xe8] sm:$0xff] %vm1006_vm2, %v1003_v56  ;;  %1021 = vst.msk [vmem:[#allocation2 + $0x70] sm:$0xff] %vm1006_vm2, %v988_v57 }
 0x267   : > { %v965_v61 = vpop.f32.mrf.mxu1 }
 0x268   : > { %v1004_v62 = vadd.f32 %v965_v61, %v683_v59 }
 0x269   : > { %v967_v63 = vpop.f32.mrf.mxu1 }
 0x26a   : > { %1037 = vst.msk [vmem:[#allocation2 + $0xf0] sm:$0xff] %vm1006_vm2, %v1004_v62  ;;  %1042 = sbr.rel (%p1448_p11) target bundleno = 686 (0x2ae), region = 48 }
 0x26b   : > { %v970_v1 = vpop.f32.mrf.mxu1 }
 0x26c   : > { %v1005_v2 = vadd.f32 %v970_v1, %v684_v0 }
 0x26d   : > { %v972_v3 = vpop.f32.mrf.mxu1 }
 0x26e   : > { %1038 = vst.msk [vmem:[#allocation2 + $0xf8] sm:$0xff] %vm1006_vm2, %v1005_v2 }
 0x26f   : > { %v1043_v4 = vld [vmem:[#allocation2] sm:$0xff]  ;;  %v1044_v6 = vld [vmem:[#allocation2 + $0x8] sm:$0xff]  ;;  %v1045_v9 = vld [vmem:[#allocation2 + $0x10] sm:$0xff] }
 0x270   : > { %v2295_v5 = vld [vmem:[%s2522_s3] ss:$0 sm:$0xff]  ;;  %v1046_v10 = vld [vmem:[#allocation2 + $0x18] sm:$0xff]  ;;  %v1048_v15 = vld [vmem:[#allocation2 + $0x28] sm:$0xff] }
 0x271   : > { %v1082_v7 = vadd.f32 %v2295_v5, %v1043_v4  ;;  %v1083_v8 = vadd.f32 %v2295_v5, %v1044_v6  ;;  %v1047_v11 = vld [vmem:[#allocation2 + $0x20] sm:$0xff]  ;;  %v1084_v12 = vadd.f32 %v2295_v5, %v1045_v9  ;;  %v1085_v13 = vadd.f32 %v2295_v5, %v1046_v10  ;;  %v1049_v18 = vld [vmem:[#allocation2 + $0x30] sm:$0xff]  ;;  %v1050_v19 = vld [vmem:[#allocation2 + $0x38] sm:$0xff] }
 0x272   : > { %v1086_v14 = vadd.f32 %v2295_v5, %v1047_v11  ;;  %v1087_v23 = vadd.f32 %v2295_v5, %v1048_v15  ;;  %v1051_v24 = vld [vmem:[#allocation2 + $0x40] sm:$0xff]  ;;  %v1052_v25 = vld [vmem:[#allocation2 + $0x48] sm:$0xff]  ;;  %v1088_v26 = vadd.f32 %v2295_v5, %v1049_v18  ;;  %v1089_v27 = vadd.f32 %v2295_v5, %v1050_v19  ;;  %v1053_v32 = vld [vmem:[#allocation2 + $0x50] sm:$0xff] }
 0x273   : > { %v1146_v16 = vmul.f32 0.70710677, %v1082_v7  ;;  %v1147_v17 = vmul.f32 0.70710677, %v1083_v8  ;;  %v1148_v20 = vmul.f32 0.70710677, %v1084_v12  ;;  %v1090_v28 = vadd.f32 %v2295_v5, %v1051_v24 }
 0x274   : > { %v1149_v21 = vmul.f32 0.70710677, %v1085_v13  ;;  %v1150_v22 = vmul.f32 0.70710677, %v1086_v14  ;;  %v2306_v29 = vmul.f32 0.5, %v1082_v7  ;;  %v1091_v31 = vadd.f32 %v2295_v5, %v1052_v25  ;;  %v1054_v35 = vld [vmem:[#allocation2 + $0x58] sm:$0xff] }
 0x275   : > { %1679 = verf.f32 %v1146_v16  ;;  %v1151_v30 = vmul.f32 0.70710677, %v1087_v23  ;;  %v2309_v33 = vmul.f32 0.5, %v1083_v8  ;;  %v1152_v34 = vmul.f32 0.70710677, %v1088_v26  ;;  %v1055_v36 = vld [vmem:[#allocation2 + $0x60] sm:$0xff] }
 0x276   : > { %1681 = verf.f32 %v1147_v17  ;;  %v1056_v37 = vld [vmem:[#allocation2 + $0x68] sm:$0xff]  ;;  %v2311_v38 = vmul.f32 0.5, %v1084_v12  ;;  %v1153_v39 = vmul.f32 0.70710677, %v1089_v27  ;;  %v1154_v40 = vmul.f32 0.70710677, %v1090_v28 }
 0x277   : > { %1683 = verf.f32 %v1148_v20  ;;  %v1057_v41 = vld [vmem:[#allocation2 + $0x70] sm:$0xff]  ;;  %v2313_v42 = vmul.f32 0.5, %v1085_v13  ;;  %v1155_v43 = vmul.f32 0.70710677, %v1091_v31  ;;  %v1092_v44 = vadd.f32 %v2295_v5, %v1053_v32  ;;  %v1058_v51 = vld [vmem:[#allocation2 + $0x78] sm:$0xff]  ;;  %v1059_v54 = vld [vmem:[#allocation2 + $0x80] sm:$0xff] }
 0x278   : > { %1685 = verf.f32 %v1149_v21  ;;  %v1093_v45 = vadd.f32 %v2295_v5, %v1054_v35  ;;  %v1094_v46 = vadd.f32 %v2295_v5, %v1055_v36  ;;  %v2319_v47 = vadd.f32 %v2295_v5, %v1056_v37  ;;  %v1060_v55 = vld [vmem:[#allocation2 + $0x88] sm:$0xff]  ;;  %v1061_v56 = vld [vmem:[#allocation2 + $0x90] sm:$0xff]  ;;  %v1062_v60 = vld [vmem:[#allocation2 + $0x98] sm:$0xff] }
 0x279   : > { %1687 = verf.f32 %v1150_v22  ;;  %v2321_v48 = vmul.f32 0.5, %v1086_v14  ;;  %v1156_v49 = vmul.f32 0.70710677, %v1092_v44  ;;  %v2324_v50 = vadd.f32 %v2295_v5, %v1057_v41  ;;  %v1063_v15 = vld [vmem:[#allocation2 + $0xa0] sm:$0xff]  ;;  %v1064_v20 = vld [vmem:[#allocation2 + $0xa8] sm:$0xff] }
 0x27a   : > { %1689 = verf.f32 %v1151_v30  ;;  %v2326_v52 = vmul.f32 0.5, %v1087_v23  ;;  %v1157_v53 = vmul.f32 0.70710677, %v1093_v45  ;;  %v2328_v57 = vmul.f32 0.5, %v1088_v26 }
 0x27b   : > { %1691 = verf.f32 %v1152_v34  ;;  %v1158_v58 = vmul.f32 0.70710677, %v1094_v46  ;;  %v1159_v59 = vmul.f32 0.70710677, %v2319_v47  ;;  %v2331_v61 = vmul.f32 0.5, %v1089_v27  ;;  %v1065_v34 = vld [vmem:[#allocation2 + $0xb0] sm:$0xff] }
 0x27c   : > { %1693 = verf.f32 %v1153_v39  ;;  %v1160_v62 = vmul.f32 0.70710677, %v2324_v50  ;;  %v2335_v63 = vadd.f32 %v2295_v5, %v1058_v51  ;;  %v2338_v0 = vadd.f32 %v2295_v5, %v1059_v54  ;;  %v1066_v39 = vld [vmem:[#allocation2 + $0xb8] sm:$0xff]  ;;  %v1067_v54 = vld [vmem:[#allocation2 + $0xc0] sm:$0xff] }
 0x27d   : > { %1695 = verf.f32 %v1154_v40  ;;  %v2341_v1 = vadd.f32 %v2295_v5, %v1060_v55  ;;  %v2344_v2 = vadd.f32 %v2295_v5, %v1061_v56  ;;  %v2346_v3 = vmul.f32 0.5, %v1090_v28 }
 0x27e   : > { %1697 = verf.f32 %v1155_v43  ;;  %v1161_v4 = vmul.f32 0.70710677, %v2335_v63  ;;  %v2350_v6 = vadd.f32 %v2295_v5, %v1062_v60  ;;  %v2352_v8 = vmul.f32 0.5, %v1091_v31 }
 0x27f   : > { %1699 = verf.f32 %v1156_v49  ;;  %v2354_v9 = vmul.f32 0.5, %v1092_v44  ;;  %v1162_v10 = vmul.f32 0.70710677, %v2338_v0  ;;  %v2357_v13 = vmul.f32 0.5, %v1093_v45 }
 0x280   : > { %1701 = verf.f32 %v1157_v53  ;;  %v1163_v14 = vmul.f32 0.70710677, %v2341_v1  ;;  %v2360_v18 = vmul.f32 0.5, %v1094_v46  ;;  %v1164_v19 = vmul.f32 0.70710677, %v2344_v2 }
 0x281   : > { %1703 = verf.f32 %v1158_v58  ;;  %v1165_v24 = vmul.f32 0.70710677, %v2350_v6  ;;  %v2367_v28 = vadd.f32 %v2295_v5, %v1063_v15  ;;  %v2373_v32 = vadd.f32 %v2295_v5, %v1064_v20 }
 0x282   : > { %v1680_v7 = vpop.eup %1679  ;;  %1705 = verf.f32 %v1159_v59  ;;  %v2379_v37 = vmul.f32 0.5, %v2319_v47  ;;  %v1128_v43 = vmul.f32 0.5, %v2324_v50  ;;  %v2391_v49 = vadd.f32 %v2295_v5, %v1065_v34  ;;  %v1068_v59 = vld [vmem:[#allocation2 + $0xc8] sm:$0xff]  ;;  %v1071_v34 = vld [vmem:[#allocation2 + $0xe0] sm:$0xff] }
 0x283   : > { %v1682_v11 = vpop.eup %1681  ;;  %v1210_v12 = vadd.f32 1.0, %v1680_v7  ;;  %1707 = verf.f32 %v1160_v62  ;;  %v1166_v44 = vmul.f32 0.70710677, %v2367_v28  ;;  %v1167_v47 = vmul.f32 0.70710677, %v2373_v32 }
 0x284   : > { %v1684_v16 = vpop.eup %1683  ;;  %v1211_v17 = vadd.f32 1.0, %v1682_v11  ;;  %1709 = verf.f32 %v1161_v4  ;;  %v2397_v53 = vadd.f32 %v2295_v5, %v1066_v39  ;;  %v1129_v58 = vmul.f32 0.5, %v2335_v63  ;;  %v1072_v39 = vld [vmem:[#allocation2 + $0xe8] sm:$0xff] }
 0x285   : > { %v1686_v21 = vpop.eup %1685  ;;  %v1242_v22 = vmul.f32 %v1210_v12, %v2306_v29  ;;  %v1212_v23 = vadd.f32 1.0, %v1684_v16  ;;  %1711 = verf.f32 %v1162_v10  ;;  %v1130_v4 = vmul.f32 0.5, %v2338_v0  ;;  %v1069_v16 = vld [vmem:[#allocation2 + $0xd0] sm:$0xff] }
 0x286   : > { %v1688_v25 = vpop.eup %1687  ;;  %v1243_v26 = vmul.f32 %v1211_v17, %v2309_v33  ;;  %v1213_v27 = vadd.f32 1.0, %v1686_v21  ;;  %1713 = verf.f32 %v1163_v14  ;;  %v1168_v7 = vmul.f32 0.70710677, %v2391_v49  ;;  %v1070_v21 = vld [vmem:[#allocation2 + $0xd8] sm:$0xff] }
 0x287   : > { %v1690_v30 = vpop.eup %1689  ;;  %1274 = vst.msk [vmem:[%s1974_s29] sm:$0xff] %vm1006_vm2, %v1242_v22  ;;  %v1244_v31 = vmul.f32 %v1212_v23, %v2311_v38  ;;  %v1214_v29 = vadd.f32 1.0, %v1688_v25  ;;  %1715 = verf.f32 %v1164_v19  ;;  %v1169_v11 = vmul.f32 0.70710677, %v2397_v53 }
 0x288   : > { %v1692_v35 = vpop.eup %1691  ;;  %1275 = vst.msk [vmem:[%s1974_s29 + $0x8] sm:$0xff] %vm1006_vm2, %v1243_v26  ;;  %v1245_v33 = vmul.f32 %v1213_v27, %v2313_v42  ;;  %v1215_v36 = vadd.f32 1.0, %v1690_v30  ;;  %1717 = verf.f32 %v1165_v24  ;;  %v2413_v12 = vadd.f32 %v2295_v5, %v1067_v54 }
 0x289   : > { %v1694_v38 = vpop.eup %1693  ;;  %1276 = vst.msk [vmem:[%s1974_s29 + $0x10] sm:$0xff] %vm1006_vm2, %v1244_v31  ;;  %v1246_v40 = vmul.f32 %v1214_v29, %v2321_v48  ;;  %v1216_v41 = vadd.f32 1.0, %v1692_v35  ;;  %1719 = verf.f32 %v1166_v44  ;;  %v2419_v15 = vadd.f32 %v2295_v5, %v1068_v59 }
 0x28a   : > { %v1696_v45 = vpop.eup %1695  ;;  %1277 = vst.msk [vmem:[%s1974_s29 + $0x18] sm:$0xff] %vm1006_vm2, %v1245_v33  ;;  %v1247_v42 = vmul.f32 %v1215_v36, %v2326_v52  ;;  %v1217_v46 = vadd.f32 1.0, %v1694_v38  ;;  %1721 = verf.f32 %v1167_v47  ;;  %v1131_v20 = vmul.f32 0.5, %v2341_v1  ;;  %v1073_v38 = vld [vmem:[#allocation2 + $0xf0] sm:$0xff] }
 0x28b   : > { %v1698_v51 = vpop.eup %1697  ;;  %1278 = vst.msk [vmem:[%s1974_s29 + $0x20] sm:$0xff] %vm1006_vm2, %v1246_v40  ;;  %v1248_v48 = vmul.f32 %v1216_v41, %v2328_v57  ;;  %v1218_v50 = vadd.f32 1.0, %v1696_v45  ;;  %1723 = verf.f32 %v1168_v7  ;;  %v1132_v24 = vmul.f32 0.5, %v2344_v2 }
 0x28c   : > { %v1700_v52 = vpop.eup %1699  ;;  %1279 = vst.msk [vmem:[%s1974_s29 + $0x28] sm:$0xff] %vm1006_vm2, %v1247_v42  ;;  %v1249_v55 = vmul.f32 %v1217_v46, %v2331_v61  ;;  %v1219_v56 = vadd.f32 1.0, %v1698_v51  ;;  %1725 = verf.f32 %v1169_v11  ;;  %v1170_v25 = vmul.f32 0.70710677, %v2413_v12 }
 0x28d   : > { %v1702_v60 = vpop.eup %1701  ;;  %1280 = vst.msk [vmem:[%s1974_s29 + $0x30] sm:$0xff] %vm1006_vm2, %v1248_v48  ;;  %v1250_v57 = vmul.f32 %v1218_v50, %v2346_v3  ;;  %v1220_v62 = vadd.f32 1.0, %v1700_v52  ;;  %v1171_v27 = vmul.f32 0.70710677, %v2419_v15  ;;  %v2435_v30 = vadd.f32 %v2295_v5, %v1069_v16  ;;  %v1074_v50 = vld [vmem:[#allocation2 + $0xf8] sm:$0xff] }
 0x28e   : > { %v1704_v10 = vpop.eup %1703  ;;  %1281 = vst.msk [vmem:[%s1974_s29 + $0x38] sm:$0xff] %vm1006_vm2, %v1249_v55  ;;  %v1251_v61 = vmul.f32 %v1219_v56, %v2352_v8  ;;  %v1221_v63 = vadd.f32 1.0, %v1702_v60  ;;  %1727 = verf.f32 %v1170_v25  ;;  %v2440_v29 = vadd.f32 %v2295_v5, %v1070_v21 }
 0x28f   : > { %v1706_v14 = vpop.eup %1705  ;;  %1282 = vst.msk [vmem:[%s1974_s29 + $0x40] sm:$0xff] %vm1006_vm2, %v1250_v57  ;;  %v1252_v0 = vmul.f32 %v1220_v62, %v2354_v9  ;;  %v1222_v3 = vadd.f32 1.0, %v1704_v10  ;;  %1729 = verf.f32 %v1171_v27  ;;  %v1134_v44 = vmul.f32 0.5, %v2367_v28 }
 0x290   : > { %v1708_v8 = vpop.eup %1707  ;;  %1283 = vst.msk [vmem:[%s1974_s29 + $0x48] sm:$0xff] %vm1006_vm2, %v1251_v61  ;;  %v1253_v17 = vmul.f32 %v1221_v63, %v2357_v13  ;;  %v1223_v19 = vadd.f32 1.0, %v1706_v14  ;;  %v1172_v45 = vmul.f32 0.70710677, %v2435_v30  ;;  %v1110_v47 = vadd.f32 %v2295_v5, %v1071_v34 }
 0x291   : > { %v1710_v22 = vpop.eup %1709  ;;  %1284 = vst.msk [vmem:[%s1974_s29 + $0x50] sm:$0xff] %vm1006_vm2, %v1252_v0  ;;  %v1254_v9 = vmul.f32 %v1222_v3, %v2360_v18  ;;  %v1224_v23 = vadd.f32 1.0, %v1708_v8  ;;  %v1111_v48 = vadd.f32 %v2295_v5, %v1072_v39  ;;  %v1112_v28 = vadd.f32 %v2295_v5, %v1073_v38 }
 0x292   : > { %v1712_v26 = vpop.eup %1711  ;;  %1285 = vst.msk [vmem:[%s1974_s29 + $0x58] sm:$0xff] %vm1006_vm2, %v1253_v17  ;;  %v1255_v13 = vmul.f32 %v1223_v19, %v2379_v37  ;;  %v1225_v1 = vadd.f32 1.0, %v1710_v22  ;;  %v1133_v37 = vmul.f32 0.5, %v2350_v6  ;;  %v1173_v6 = vmul.f32 0.70710677, %v2440_v29 }
 0x293   : > { %v1714_v31 = vpop.eup %1713  ;;  %1286 = vst.msk [vmem:[%s1974_s29 + $0x60] sm:$0xff] %vm1006_vm2, %v1254_v9  ;;  %v1256_v18 = vmul.f32 %v1224_v23, %v1128_v43  ;;  %v1226_v2 = vadd.f32 1.0, %v1712_v26  ;;  %1731 = verf.f32 %v1172_v45  ;;  %v1135_v55 = vmul.f32 0.5, %v2373_v32 }
 0x294   : > { %v1716_v35 = vpop.eup %1715  ;;  %1287 = vst.msk [vmem:[%s1974_s29 + $0x68] sm:$0xff] %vm1006_vm2, %v1255_v13  ;;  %v1257_v33 = vmul.f32 %v1225_v1, %v1129_v58  ;;  %v1227_v36 = vadd.f32 1.0, %v1714_v31  ;;  %1733 = verf.f32 %v1173_v6  ;;  %v1174_v56 = vmul.f32 0.70710677, %v1110_v47 }
 0x295   : > { %v1718_v40 = vpop.eup %1717  ;;  %1288 = vst.msk [vmem:[%s1974_s29 + $0x70] sm:$0xff] %vm1006_vm2, %v1256_v18  ;;  %v1258_v41 = vmul.f32 %v1226_v2, %v1130_v4  ;;  %v1228_v43 = vadd.f32 1.0, %v1716_v35  ;;  %v1175_v60 = vmul.f32 0.70710677, %v1111_v48  ;;  %v1176_v62 = vmul.f32 0.70710677, %v1112_v28 }
 0x296   : > { %1289 = vst.msk [vmem:[%s1974_s29 + $0x78] sm:$0xff] %vm1006_vm2, %v1257_v33  ;;  %v1259_v42 = vmul.f32 %v1227_v36, %v1131_v20  ;;  %v1229_v46 = vadd.f32 1.0, %v1718_v40  ;;  %v1720_v54 = vpop.eup %1719  ;;  %1735 = verf.f32 %v1174_v56  ;;  %v1113_v4 = vadd.f32 %v2295_v5, %v1074_v50 }
 0x297   : > { %1290 = vst.msk [vmem:[%s1974_s29 + $0x80] sm:$0xff] %vm1006_vm2, %v1258_v41  ;;  %v1260_v51 = vmul.f32 %v1228_v43, %v1132_v24  ;;  %v1722_v58 = vpop.eup %1721  ;;  %v1230_v59 = vadd.f32 1.0, %v1720_v54  ;;  %v1136_v10 = vmul.f32 0.5, %v2391_v49  ;;  %1737 = verf.f32 %v1175_v60 }
 0x298   : > { %1291 = vst.msk [vmem:[%s1974_s29 + $0x88] sm:$0xff] %vm1006_vm2, %v1259_v42  ;;  %v1261_v52 = vmul.f32 %v1229_v46, %v1133_v37  ;;  %v1231_v57 = vadd.f32 1.0, %v1722_v58  ;;  %v1724_v32 = vpop.eup %1723  ;;  %v1137_v63 = vmul.f32 0.5, %v2397_v53  ;;  %1739 = verf.f32 %v1176_v62 }
 0x299   : > { %1292 = vst.msk [vmem:[%s1974_s29 + $0x90] sm:$0xff] %vm1006_vm2, %v1260_v51  ;;  %v1262_v7 = vmul.f32 %v1230_v59, %v1134_v44  ;;  %v1177_v11 = vmul.f32 0.70710677, %v1113_v4  ;;  %v1726_v14 = vpop.eup %1725  ;;  %v1232_v0 = vadd.f32 1.0, %v1724_v32  ;;  %v1138_v49 = vmul.f32 0.5, %v2413_v12 }
 0x29a   : > { %1293 = vst.msk [vmem:[%s1974_s29 + $0x98] sm:$0xff] %vm1006_vm2, %v1261_v52  ;;  %v1263_v61 = vmul.f32 %v1231_v57, %v1135_v55  ;;  %v1233_v3 = vadd.f32 1.0, %v1726_v14  ;;  %v1139_v53 = vmul.f32 0.5, %v2419_v15  ;;  %v1140_v22 = vmul.f32 0.5, %v2435_v30 }
 0x29b   : > { %1294 = vst.msk [vmem:[%s1974_s29 + $0xa0] sm:$0xff] %vm1006_vm2, %v1262_v7  ;;  %1741 = verf.f32 %v1177_v11  ;;  %v1264_v5 = vmul.f32 %v1232_v0, %v1136_v10  ;;  %v1728_v16 = vpop.eup %1727  ;;  %v1141_v12 = vmul.f32 0.5, %v2440_v29  ;;  %v1142_v26 = vmul.f32 0.5, %v1110_v47 }
 0x29c   : > { %1295 = vst.msk [vmem:[%s1974_s29 + $0xa8] sm:$0xff] %vm1006_vm2, %v1263_v61  ;;  %v1265_v8 = vmul.f32 %v1233_v3, %v1137_v63  ;;  %v1730_v17 = vpop.eup %1729  ;;  %v1234_v19 = vadd.f32 1.0, %v1728_v16  ;;  %v1143_v27 = vmul.f32 0.5, %v1111_v48  ;;  %v1144_v2 = vmul.f32 0.5, %v1112_v28 }
 0x29d   : > { %1296 = vst.msk [vmem:[%s1974_s29 + $0xb0] sm:$0xff] %vm1006_vm2, %v1264_v5  ;;  %v1235_v20 = vadd.f32 1.0, %v1730_v17  ;;  %v1145_v36 = vmul.f32 0.5, %v1113_v4 }
 0x29e   : > { %1297 = vst.msk [vmem:[%s1974_s29 + $0xb8] sm:$0xff] %vm1006_vm2, %v1265_v8  ;;  %v1266_v21 = vmul.f32 %v1234_v19, %v1138_v49 }
 0x29f   : > { %v1267_v23 = vmul.f32 %v1235_v20, %v1139_v53 }
 0x2a0   : > { %v1732_v9 = vpop.eup %1731  ;;  %1298 = vst.msk [vmem:[%s1974_s29 + $0xc0] sm:$0xff] %vm1006_vm2, %v1266_v21 }
 0x2a1   : > { %v1734_v24 = vpop.eup %1733  ;;  %v1236_v15 = vadd.f32 1.0, %v1732_v9  ;;  %1299 = vst.msk [vmem:[%s1974_s29 + $0xc8] sm:$0xff] %vm1006_vm2, %v1267_v23 }
 0x2a2   : > { %v1237_v25 = vadd.f32 1.0, %v1734_v24 }
 0x2a3   : > { %v1736_v13 = vpop.eup %1735  ;;  %v1268_v1 = vmul.f32 %v1236_v15, %v1140_v22 }
 0x2a4   : > { %v1738_v31 = vpop.eup %1737  ;;  %v1269_v30 = vmul.f32 %v1237_v25, %v1141_v12  ;;  %v1238_v18 = vadd.f32 1.0, %v1736_v13 }
 0x2a5   : > { %v1740_v29 = vpop.eup %1739  ;;  %1300 = vst.msk [vmem:[%s1974_s29 + $0xd0] sm:$0xff] %vm1006_vm2, %v1268_v1  ;;  %v1239_v34 = vadd.f32 1.0, %v1738_v31 }
 0x2a6   : > { %1301 = vst.msk [vmem:[%s1974_s29 + $0xd8] sm:$0xff] %vm1006_vm2, %v1269_v30  ;;  %v1270_v35 = vmul.f32 %v1238_v18, %v1142_v26  ;;  %v1240_v33 = vadd.f32 1.0, %v1740_v29 }
 0x2a7   : > { %v1271_v39 = vmul.f32 %v1239_v34, %v1143_v27 }
 0x2a8   : > { %v1742_v37 = vpop.eup %1741  ;;  %1302 = vst.msk [vmem:[%s1974_s29 + $0xe0] sm:$0xff] %vm1006_vm2, %v1270_v35  ;;  %v1272_v38 = vmul.f32 %v1240_v33, %v1144_v2 }
 0x2a9   : > { %v1241_v40 = vadd.f32 1.0, %v1742_v37  ;;  %1303 = vst.msk [vmem:[%s1974_s29 + $0xe8] sm:$0xff] %vm1006_vm2, %v1271_v39 }
 0x2aa   : > { %1304 = vst.msk [vmem:[%s1974_s29 + $0xf0] sm:$0xff] %vm1006_vm2, %v1272_v38 }
 0x2ab   : > { %v1273_v41 = vmul.f32 %v1241_v40, %v1145_v36 }
 0x2ad   : > { %1305 = vst.msk [vmem:[%s1974_s29 + $0xf8] sm:$0xff] %vm1006_vm2, %v1273_v41 }
 0x2ae PF: > { %s17_s22 = sadd.s32 1, %s1837_s22   ;;  %s2529_s14 = sld [smem:[#allocation6_spill]] }
 0x2af   : > { %p14_p12 = scmp.ge.s32.totalorder %s17_s22, 6   ;;  %s2530_s15 = smov %s1813_s16 }
 0x2b0   : > { %s2531_s16 = smov %s1817_s17  ;;  %s2532_s17 = smov %s1937_s9 }
 0x2b1   : > { %s2533_s18 = smov %s1829_s20  ;;  %s2534_s19 = smov %s1833_s21 }
 0x2b2   : > { %s2536_s21 = smov %s2542_s25  ;;  %16 = sbr.rel (!%p14_p12) target bundleno = 5 (0x5), region = 87 }
 0x2b4   : > { %s2535_s20 = smov %s2529_s14 }
 0x2b7   :  { %1328 = vsyncpa [#allocation4], 1 }
 0x2b8   :  { %1330 = vsyncpa [#allocation4 + $0x1], 1 }

</bundles_post_ra>
